<compile_context>
chip_gen: v6e
topology: v6e:2x2x1
jax: 0.10.0
libtpu: 0.0.40
codegen_flags: <defaults>
</compile_context>

<pallas_src>
import functools

import jax
import jax.numpy as jnp
from jax.experimental import pallas as pl
from jax.experimental.pallas import tpu as pltpu


def _cnn2_kernel(layers, dims, tok_ref, emb_hbm, *refs):
    """One grid step == one batch element.

    tok_ref : (B*L0,) int32 in SMEM (scalar prefetch)
    emb_hbm : (V, E) f32 in HBM (memory_space=pl.ANY), DMA-gathered
    refs    : n conv weights (K,Cin,Cout) bf16 | wlin (C_last,out_pad) bf16 |
              blin (1,out_pad) f32 | out (1,1,out_pad) f32 |
              g_scr (L0,E) f32 | x_scr (L0,Cmax) f32 | DMA semaphore
    """
    n = len(layers)
    w_refs = refs[:n]
    wlin_ref = refs[n]
    blin_ref = refs[n + 1]
    out_ref = refs[n + 2]
    g_scr = refs[n + 3]          # gathered embedding rows
    x_scr = refs[n + 4]          # single shared buffer for strided taps/pools
    sem = refs[n + 5]

    L0, E, K = dims
    b = pl.program_id(0)

    # ---- Embedding: real gather.  DMA the L0 needed rows from HBM to VMEM. ----
    # TODO(synk): for long sequences switch this static unroll to a pl.loop with
    # a chunked, double-buffered gather.
    copies = []
    for t in range(L0):
        tok = tok_ref[b * L0 + t]
        cp = pltpu.make_async_copy(emb_hbm.at[pl.ds(tok, 1), :],
                                   g_scr.at[pl.ds(t, 1), :], sem)
        cp.start()
        copies.append(cp)
    for cp in copies:
        cp.wait()

    x = None                     # current activation (L, C) f32 value
    L, cin = L0, E
    for i, (ksz, stride, cout) in enumerate(layers):
        # ---- Conv1d (bias=False): K accumulated bf16 MXU dots, then ReLU ----
        Lc = (L - K) // stride + 1
        if i > 0 and stride > 1:
            x_scr[0:L, 0:cin] = x            # only strided layers store to scratch
        h = None
        for k in range(K):
            if i == 0:
                tap = (g_scr[pl.ds(k, Lc, stride=stride), :] if stride > 1
                       else g_scr[k:k + Lc, :])
            elif stride > 1:
                tap = x_scr[pl.ds(k, Lc, stride=stride), 0:cin]
            else:
                tap = x[k:k + Lc, :]
            p = jnp.dot(tap.astype(jnp.bfloat16), w_refs[i][k],
                        preferred_element_type=jnp.float32)
            h = p if h is None else h + p
        h = jnp.maximum(h, 0.0)              # ReLU in f32 (v5e: no bf16 VPU)

        # ---- MaxPool1d(kernel_size=ksz, stride=stride) ----
        Lp = (Lc - ksz) // stride + 1
        if stride > 1:
            x_scr[0:Lc, 0:cout] = h          # reuse the SAME scratch buffer
            m = x_scr[pl.ds(0, Lp, stride=stride), 0:cout]
            for k in range(1, ksz):
                m = jnp.maximum(m, x_scr[pl.ds(k, Lp, stride=stride), 0:cout])
        else:
            m = h[0:Lp, :]
            for k in range(1, ksz):
                m = jnp.maximum(m, h[k:k + Lp, :])

        x, L, cin = m, Lp, cout

    # ---- global max over time, then Linear (lane-dense 128-padded output) ----
    feat = jnp.max(x, axis=0, keepdims=True)                       # (1, C_last) f32
    y = jnp.dot(feat.astype(jnp.bfloat16), wlin_ref[...],
                preferred_element_type=jnp.float32)
    out_ref[0] = y + blin_ref[...]


def _vmem_tile_bytes(shape, itemsize):
    """Generous (8,128)-tile-padded VMEM footprint estimate."""
    dims = list(shape)
    if len(dims) < 2:
        dims = [1] + dims
    dims[-1] = -(-dims[-1] // 128) * 128
    dims[-2] = -(-dims[-2] // 16) * 16
    n = 1
    for d in dims:
        n *= d
    return n * itemsize


def cnn2_forward(tokens, emb_table, conv_ws, wlin, blin, layers):
    """tokens: (B, L) int32 ids.  Returns (B, out_dim) float32."""
    B, L0 = tokens.shape
    V, E = emb_table.shape
    out_dim = wlin.shape[1]
    out_pad = max(128, ((out_dim + 127) // 128) * 128)             # lane-dense output
    K = layers[0][0]                                               # shared conv kernel size (module quirk)
    couts = [c for (_, _, c) in layers]
    cmax = max(E, *couts)

    # ---- host-side layout / dtype prep (bf16 MXU operands, f32 accumulation) ----
    tok_flat = tokens.astype(jnp.int32).reshape(-1)                # (B*L0,) -> SMEM
    emb_f32 = emb_table.astype(jnp.float32)                        # stays in HBM
    w3ds = [w.astype(jnp.bfloat16) for w in conv_ws]               # (K, Cin, Cout)
    wlin_p = jnp.pad(wlin.astype(jnp.float32),
                     ((0, 0), (0, out_pad - out_dim))).astype(jnp.bfloat16)
    blin_p = jnp.pad(blin.astype(jnp.float32), ((0, 0), (0, out_pad - out_dim)))

    # ---- cost estimate + explicit VMEM budget (v5e 16MiB scoped / v7x 64MiB) ----
    flops = 0
    L, cin = L0, E
    for (ksz, stride, cout) in layers:
        Lc = (L - K) // stride + 1
        Lp = (Lc - ksz) // stride + 1
        flops += 2 * B * Lc * K * cin * cout
        L, cin = Lp, cout
    flops += 2 * B * cin * out_pad
    bytes_accessed = (4 * B * L0 + 4 * B * L0 * E + 4 * B * out_pad
                      + sum(int(w.size) * 2 for w in w3ds)
                      + int(wlin_p.size) * 2 + int(blin_p.size) * 4)

    in_vmem = (sum(_vmem_tile_bytes(w.shape, 2) for w in w3ds)
               + _vmem_tile_bytes(wlin_p.shape, 2)
               + _vmem_tile_bytes(blin_p.shape, 4))
    out_vmem = _vmem_tile_bytes((1, 1, out_pad), 4)
    scr_vmem = _vmem_tile_bytes((L0, E), 4) + _vmem_tile_bytes((L0, cmax), 4)
    vmem_limit = int(2 * (in_vmem + out_vmem) + scr_vmem + (4 << 20))

    grid_spec = pltpu.PrefetchScalarGridSpec(
        num_scalar_prefetch=1,              # token ids -> SMEM
        grid=(B,),                          # one batch element per program
        in_specs=[
            pl.BlockSpec(memory_space=pl.ANY),                      # emb table (HBM)
            *[pl.BlockSpec(tuple(w.shape), lambda b, tok: (0, 0, 0)) for w in w3ds],
            pl.BlockSpec(tuple(wlin_p.shape), lambda b, tok: (0, 0)),
            pl.BlockSpec(tuple(blin_p.shape), lambda b, tok: (0, 0)),
        ],
        out_specs=pl.BlockSpec((1, 1, out_pad), lambda b, tok: (b, 0, 0)),
        scratch_shapes=[
            pltpu.VMEM((L0, E), jnp.float32),       # gathered embeddings
            pltpu.VMEM((L0, cmax), jnp.float32),    # ONE shared strided-layer buffer
            pltpu.SemaphoreType.DMA,                # gather DMA completion
        ],
    )

    kernel = functools.partial(_cnn2_kernel, tuple(layers), (L0, E, K))
    out = pl.pallas_call(
        kernel,
        out_shape=jax.ShapeDtypeStruct((B, 1, out_pad), jnp.float32),
        grid_spec=grid_spec,
        compiler_params=pltpu.CompilerParams(
            dimension_semantics=("parallel",),      # v7x: spread batch over both TCs
            vmem_limit_bytes=vmem_limit),
        cost_estimate=pl.CostEstimate(flops=int(flops), transcendentals=0,
                                      bytes_accessed=int(bytes_accessed)),
    )(tok_flat, emb_f32, *w3ds, wlin_p, blin_p)

    return out[:, 0, :out_dim]


def cnn2_reference(tokens, emb_table, conv_ws, wlin, blin, layers):
    """Pure-JAX f32 reference (same math as torch CNN2.forward)."""
    x = emb_table[tokens].astype(jnp.float32)                      # (B, L, E)
    K = layers[0][0]
    for i, (ksz, stride, cout) in enumerate(layers):
        B, L, cin = x.shape
        Lc = (L - K) // stride + 1
        acc = jnp.zeros((B, Lc, cout), jnp.float32)
        for k in range(K):
            acc = acc + x[:, k:k + stride * (Lc - 1) + 1:stride, :] @ conv_ws[i][k]
        h = jnp.maximum(acc, 0.0)
        Lp = (Lc - ksz) // stride + 1
        m = h[:, 0:stride * (Lp - 1) + 1:stride, :]
        for k in range(1, ksz):
            m = jnp.maximum(m, h[:, k:k + stride * (Lp - 1) + 1:stride, :])
        x = m
    feat = jnp.max(x, axis=1)
    return feat @ wlin + blin


if __name__ == "__main__":
    # Module hyper-params: layers = [(kernel, stride, out_channels), ...]
    layers = [(3, 1, 8), (3, 2, 16)]
    embedding_dim = 8
    vocab_dim = 32
    out_dim = 5
    B, L = 2, 24

    key = jax.random.PRNGKey(0)
    k_tok, k_emb, k_lin_w, k_lin_b, *k_convs = jax.random.split(key, 4 + len(layers))

    tokens = jax.random.randint(k_tok, (B, L), 0, vocab_dim, dtype=jnp.int32)
    emb_table = jax.random.normal(k_emb, (vocab_dim, embedding_dim), jnp.float32)

    K_conv = layers[0][0]
    conv_ws = []
    chan = embedding_dim
    for i, (ksz, stride, cout) in enumerate(layers):
        # stored as (K, Cin, Cout) — i.e. torch weight (Cout, Cin, K) transposed
        conv_ws.append(0.1 * jax.random.normal(k_convs[i], (K_conv, chan, cout), jnp.float32))
        chan = cout
    wlin = 0.1 * jax.random.normal(k_lin_w, (chan, out_dim), jnp.float32)   # torch (out,in).T
    blin = 0.1 * jax.random.normal(k_lin_b, (1, out_dim), jnp.float32)

    out = cnn2_forward(tokens, emb_table, conv_ws, wlin, blin, layers)
    out = jax.block_until_ready(out)

    ref = cnn2_reference(tokens, emb_table, conv_ws, wlin, blin, layers)
    assert out.shape == (B, out_dim)
    # bf16 MXU operands (f32 accumulation) vs. pure-f32 reference -> loose tolerance.
    assert jnp.allclose(out, ref, rtol=2e-2, atol=2e-2), (out, ref)

    print("KERNEL_OK")
</pallas_src>

<mosaic_0001>
module attributes {stable_mosaic.version = 11 : i64} {
  func.func @_cnn2_kernel(%arg0: i32, %arg1: memref<48xi32, #tpu.memory_space<smem>>, %arg2: memref<32x8xf32, #tpu.memory_space<any>>, %arg3: memref<3x8x8xbf16, #tpu.memory_space<vmem>>, %arg4: memref<3x8x16xbf16, #tpu.memory_space<vmem>>, %arg5: memref<16x128xbf16, #tpu.memory_space<vmem>>, %arg6: memref<1x128xf32, #tpu.memory_space<vmem>>, %arg7: memref<1x1x128xf32, #tpu.memory_space<vmem>>, %arg8: memref<24x8xf32, #tpu.memory_space<vmem>>, %arg9: memref<24x16xf32, #tpu.memory_space<vmem>>, %arg10: memref<!tpu.dma_semaphore, #tpu.memory_space<semaphore_mem>>) attributes {dimension_semantics = [#tpu.dimension_semantics<parallel>], iteration_bounds = array<i64: 2>, scalar_prefetch = 1 : i64, scratch_operands = 3 : i64, tpu.core_type = #tpu.core_type<tc>, window_params = [{}, {pipeline_mode = #tpu.pipeline_mode<synchronous>, transform_indices = @transform_1, window_bounds = array<i64: 3, 8, 8>}, {pipeline_mode = #tpu.pipeline_mode<synchronous>, transform_indices = @transform_2, window_bounds = array<i64: 3, 8, 16>}, {pipeline_mode = #tpu.pipeline_mode<synchronous>, transform_indices = @transform_3, window_bounds = array<i64: 16, 128>}, {pipeline_mode = #tpu.pipeline_mode<synchronous>, transform_indices = @transform_4, window_bounds = array<i64: 1, 128>}, {transform_indices = @transform_5, window_bounds = array<i64: 1, 1, 128>}]} {
    %c24_i32 = arith.constant 24 : i32
    %0 = arith.muli %arg0, %c24_i32 : i32
    %c0_i32 = arith.constant 0 : i32
    %1 = arith.addi %0, %c0_i32 : i32
    %2 = arith.index_cast %1 : i32 to index
    %3 = memref.load %arg1[%2] : memref<48xi32, #tpu.memory_space<smem>>
    %c0_i32_0 = arith.constant 0 : i32
    %4 = tpu.memref_slice %arg2[%3, %c0_i32_0] : memref<32x8xf32, #tpu.memory_space<any>> -> memref<1x8xf32, #tpu.memory_space<any>>
    %c0_i32_1 = arith.constant 0 : i32
    %c0_i32_2 = arith.constant 0 : i32
    %5 = tpu.memref_slice %arg8[%c0_i32_1, %c0_i32_2] : memref<24x8xf32, #tpu.memory_space<vmem>> -> memref<1x8xf32, #tpu.memory_space<vmem>>
    tpu.enqueue_dma source(%4 : memref<1x8xf32, #tpu.memory_space<any>>) target(%5 : memref<1x8xf32, #tpu.memory_space<vmem>>) target_semaphore(%arg10 : memref<!tpu.dma_semaphore, #tpu.memory_space<semaphore_mem>>)
    %c24_i32_3 = arith.constant 24 : i32
    %6 = arith.muli %arg0, %c24_i32_3 : i32
    %c1_i32 = arith.constant 1 : i32
    %7 = arith.addi %6, %c1_i32 : i32
    %8 = arith.index_cast %7 : i32 to index
    %9 = memref.load %arg1[%8] : memref<48xi32, #tpu.memory_space<smem>>
    %c0_i32_4 = arith.constant 0 : i32
    %10 = tpu.memref_slice %arg2[%9, %c0_i32_4] : memref<32x8xf32, #tpu.memory_space<any>> -> memref<1x8xf32, #tpu.memory_space<any>>
    %c1_i32_5 = arith.constant 1 : i32
    %c0_i32_6 = arith.constant 0 : i32
    %11 = tpu.memref_slice %arg8[%c1_i32_5, %c0_i32_6] : memref<24x8xf32, #tpu.memory_space<vmem>> -> memref<1x8xf32, #tpu.memory_space<vmem>>
    tpu.enqueue_dma source(%10 : memref<1x8xf32, #tpu.memory_space<any>>) target(%11 : memref<1x8xf32, #tpu.memory_space<vmem>>) target_semaphore(%arg10 : memref<!tpu.dma_semaphore, #tpu.memory_space<semaphore_mem>>)
    %c24_i32_7 = arith.constant 24 : i32
    %12 = arith.muli %arg0, %c24_i32_7 : i32
    %c2_i32 = arith.constant 2 : i32
    %13 = arith.addi %12, %c2_i32 : i32
    %14 = arith.index_cast %13 : i32 to index
    %15 = memref.load %arg1[%14] : memref<48xi32, #tpu.memory_space<smem>>
    %c0_i32_8 = arith.constant 0 : i32
    %16 = tpu.memref_slice %arg2[%15, %c0_i32_8] : memref<32x8xf32, #tpu.memory_space<any>> -> memref<1x8xf32, #tpu.memory_space<any>>
    %c2_i32_9 = arith.constant 2 : i32
    %c0_i32_10 = arith.constant 0 : i32
    %17 = tpu.memref_slice %arg8[%c2_i32_9, %c0_i32_10] : memref<24x8xf32, #tpu.memory_space<vmem>> -> memref<1x8xf32, #tpu.memory_space<vmem>>
    tpu.enqueue_dma source(%16 : memref<1x8xf32, #tpu.memory_space<any>>) target(%17 : memref<1x8xf32, #tpu.memory_space<vmem>>) target_semaphore(%arg10 : memref<!tpu.dma_semaphore, #tpu.memory_space<semaphore_mem>>)
    %c24_i32_11 = arith.constant 24 : i32
    %18 = arith.muli %arg0, %c24_i32_11 : i32
    %c3_i32 = arith.constant 3 : i32
    %19 = arith.addi %18, %c3_i32 : i32
    %20 = arith.index_cast %19 : i32 to index
    %21 = memref.load %arg1[%20] : memref<48xi32, #tpu.memory_space<smem>>
    %c0_i32_12 = arith.constant 0 : i32
    %22 = tpu.memref_slice %arg2[%21, %c0_i32_12] : memref<32x8xf32, #tpu.memory_space<any>> -> memref<1x8xf32, #tpu.memory_space<any>>
    %c3_i32_13 = arith.constant 3 : i32
    %c0_i32_14 = arith.constant 0 : i32
    %23 = tpu.memref_slice %arg8[%c3_i32_13, %c0_i32_14] : memref<24x8xf32, #tpu.memory_space<vmem>> -> memref<1x8xf32, #tpu.memory_space<vmem>>
    tpu.enqueue_dma source(%22 : memref<1x8xf32, #tpu.memory_space<any>>) target(%23 : memref<1x8xf32, #tpu.memory_space<vmem>>) target_semaphore(%arg10 : memref<!tpu.dma_semaphore, #tpu.memory_space<semaphore_mem>>)
    %c24_i32_15 = arith.constant 24 : i32
    %24 = arith.muli %arg0, %c24_i32_15 : i32
    %c4_i32 = arith.constant 4 : i32
    %25 = arith.addi %24, %c4_i32 : i32
    %26 = arith.index_cast %25 : i32 to index
    %27 = memref.load %arg1[%26] : memref<48xi32, #tpu.memory_space<smem>>
    %c0_i32_16 = arith.constant 0 : i32
    %28 = tpu.memref_slice %arg2[%27, %c0_i32_16] : memref<32x8xf32, #tpu.memory_space<any>> -> memref<1x8xf32, #tpu.memory_space<any>>
    %c4_i32_17 = arith.constant 4 : i32
    %c0_i32_18 = arith.constant 0 : i32
    %29 = tpu.memref_slice %arg8[%c4_i32_17, %c0_i32_18] : memref<24x8xf32, #tpu.memory_space<vmem>> -> memref<1x8xf32, #tpu.memory_space<vmem>>
    tpu.enqueue_dma source(%28 : memref<1x8xf32, #tpu.memory_space<any>>) target(%29 : memref<1x8xf32, #tpu.memory_space<vmem>>) target_semaphore(%arg10 : memref<!tpu.dma_semaphore, #tpu.memory_space<semaphore_mem>>)
    %c24_i32_19 = arith.constant 24 : i32
    %30 = arith.muli %arg0, %c24_i32_19 : i32
    %c5_i32 = arith.constant 5 : i32
    %31 = arith.addi %30, %c5_i32 : i32
    %32 = arith.index_cast %31 : i32 to index
    %33 = memref.load %arg1[%32] : memref<48xi32, #tpu.memory_space<smem>>
    %c0_i32_20 = arith.constant 0 : i32
    %34 = tpu.memref_slice %arg2[%33, %c0_i32_20] : memref<32x8xf32, #tpu.memory_space<any>> -> memref<1x8xf32, #tpu.memory_space<any>>
    %c5_i32_21 = arith.constant 5 : i32
    %c0_i32_22 = arith.constant 0 : i32
    %35 = tpu.memref_slice %arg8[%c5_i32_21, %c0_i32_22] : memref<24x8xf32, #tpu.memory_space<vmem>> -> memref<1x8xf32, #tpu.memory_space<vmem>>
    tpu.enqueue_dma source(%34 : memref<1x8xf32, #tpu.memory_space<any>>) target(%35 : memref<1x8xf32, #tpu.memory_space<vmem>>) target_semaphore(%arg10 : memref<!tpu.dma_semaphore, #tpu.memory_space<semaphore_mem>>)
    %c24_i32_23 = arith.constant 24 : i32
    %36 = arith.muli %arg0, %c24_i32_23 : i32
    %c6_i32 = arith.constant 6 : i32
    %37 = arith.addi %36, %c6_i32 : i32
    %38 = arith.index_cast %37 : i32 to index
    %39 = memref.load %arg1[%38] : memref<48xi32, #tpu.memory_space<smem>>
    %c0_i32_24 = arith.constant 0 : i32
    %40 = tpu.memref_slice %arg2[%39, %c0_i32_24] : memref<32x8xf32, #tpu.memory_space<any>> -> memref<1x8xf32, #tpu.memory_space<any>>
    %c6_i32_25 = arith.constant 6 : i32
    %c0_i32_26 = arith.constant 0 : i32
    %41 = tpu.memref_slice %arg8[%c6_i32_25, %c0_i32_26] : memref<24x8xf32, #tpu.memory_space<vmem>> -> memref<1x8xf32, #tpu.memory_space<vmem>>
    tpu.enqueue_dma source(%40 : memref<1x8xf32, #tpu.memory_space<any>>) target(%41 : memref<1x8xf32, #tpu.memory_space<vmem>>) target_semaphore(%arg10 : memref<!tpu.dma_semaphore, #tpu.memory_space<semaphore_mem>>)
    %c24_i32_27 = arith.constant 24 : i32
    %42 = arith.muli %arg0, %c24_i32_27 : i32
    %c7_i32 = arith.constant 7 : i32
    %43 = arith.addi %42, %c7_i32 : i32
    %44 = arith.index_cast %43 : i32 to index
    %45 = memref.load %arg1[%44] : memref<48xi32, #tpu.memory_space<smem>>
    %c0_i32_28 = arith.constant 0 : i32
    %46 = tpu.memref_slice %arg2[%45, %c0_i32_28] : memref<32x8xf32, #tpu.memory_space<any>> -> memref<1x8xf32, #tpu.memory_space<any>>
    %c7_i32_29 = arith.constant 7 : i32
    %c0_i32_30 = arith.constant 0 : i32
    %47 = tpu.memref_slice %arg8[%c7_i32_29, %c0_i32_30] : memref<24x8xf32, #tpu.memory_space<vmem>> -> memref<1x8xf32, #tpu.memory_space<vmem>>
    tpu.enqueue_dma source(%46 : memref<1x8xf32, #tpu.memory_space<any>>) target(%47 : memref<1x8xf32, #tpu.memory_space<vmem>>) target_semaphore(%arg10 : memref<!tpu.dma_semaphore, #tpu.memory_space<semaphore_mem>>)
    %c24_i32_31 = arith.constant 24 : i32
    %48 = arith.muli %arg0, %c24_i32_31 : i32
    %c8_i32 = arith.constant 8 : i32
    %49 = arith.addi %48, %c8_i32 : i32
    %50 = arith.index_cast %49 : i32 to index
    %51 = memref.load %arg1[%50] : memref<48xi32, #tpu.memory_space<smem>>
    %c0_i32_32 = arith.constant 0 : i32
    %52 = tpu.memref_slice %arg2[%51, %c0_i32_32] : memref<32x8xf32, #tpu.memory_space<any>> -> memref<1x8xf32, #tpu.memory_space<any>>
    %c8_i32_33 = arith.constant 8 : i32
    %c0_i32_34 = arith.constant 0 : i32
    %53 = tpu.memref_slice %arg8[%c8_i32_33, %c0_i32_34] : memref<24x8xf32, #tpu.memory_space<vmem>> -> memref<1x8xf32, #tpu.memory_space<vmem>>
    tpu.enqueue_dma source(%52 : memref<1x8xf32, #tpu.memory_space<any>>) target(%53 : memref<1x8xf32, #tpu.memory_space<vmem>>) target_semaphore(%arg10 : memref<!tpu.dma_semaphore, #tpu.memory_space<semaphore_mem>>)
    %c24_i32_35 = arith.constant 24 : i32
    %54 = arith.muli %arg0, %c24_i32_35 : i32
    %c9_i32 = arith.constant 9 : i32
    %55 = arith.addi %54, %c9_i32 : i32
    %56 = arith.index_cast %55 : i32 to index
    %57 = memref.load %arg1[%56] : memref<48xi32, #tpu.memory_space<smem>>
    %c0_i32_36 = arith.constant 0 : i32
    %58 = tpu.memref_slice %arg2[%57, %c0_i32_36] : memref<32x8xf32, #tpu.memory_space<any>> -> memref<1x8xf32, #tpu.memory_space<any>>
    %c9_i32_37 = arith.constant 9 : i32
    %c0_i32_38 = arith.constant 0 : i32
    %59 = tpu.memref_slice %arg8[%c9_i32_37, %c0_i32_38] : memref<24x8xf32, #tpu.memory_space<vmem>> -> memref<1x8xf32, #tpu.memory_space<vmem>>
    tpu.enqueue_dma source(%58 : memref<1x8xf32, #tpu.memory_space<any>>) target(%59 : memref<1x8xf32, #tpu.memory_space<vmem>>) target_semaphore(%arg10 : memref<!tpu.dma_semaphore, #tpu.memory_space<semaphore_mem>>)
    %c24_i32_39 = arith.constant 24 : i32
    %60 = arith.muli %arg0, %c24_i32_39 : i32
    %c10_i32 = arith.constant 10 : i32
    %61 = arith.addi %60, %c10_i32 : i32
    %62 = arith.index_cast %61 : i32 to index
    %63 = memref.load %arg1[%62] : memref<48xi32, #tpu.memory_space<smem>>
    %c0_i32_40 = arith.constant 0 : i32
    %64 = tpu.memref_slice %arg2[%63, %c0_i32_40] : memref<32x8xf32, #tpu.memory_space<any>> -> memref<1x8xf32, #tpu.memory_space<any>>
    %c10_i32_41 = arith.constant 10 : i32
    %c0_i32_42 = arith.constant 0 : i32
    %65 = tpu.memref_slice %arg8[%c10_i32_41, %c0_i32_42] : memref<24x8xf32, #tpu.memory_space<vmem>> -> memref<1x8xf32, #tpu.memory_space<vmem>>
    tpu.enqueue_dma source(%64 : memref<1x8xf32, #tpu.memory_space<any>>) target(%65 : memref<1x8xf32, #tpu.memory_space<vmem>>) target_semaphore(%arg10 : memref<!tpu.dma_semaphore, #tpu.memory_space<semaphore_mem>>)
    %c24_i32_43 = arith.constant 24 : i32
    %66 = arith.muli %arg0, %c24_i32_43 : i32
    %c11_i32 = arith.constant 11 : i32
    %67 = arith.addi %66, %c11_i32 : i32
    %68 = arith.index_cast %67 : i32 to index
    %69 = memref.load %arg1[%68] : memref<48xi32, #tpu.memory_space<smem>>
    %c0_i32_44 = arith.constant 0 : i32
    %70 = tpu.memref_slice %arg2[%69, %c0_i32_44] : memref<32x8xf32, #tpu.memory_space<any>> -> memref<1x8xf32, #tpu.memory_space<any>>
    %c11_i32_45 = arith.constant 11 : i32
    %c0_i32_46 = arith.constant 0 : i32
    %71 = tpu.memref_slice %arg8[%c11_i32_45, %c0_i32_46] : memref<24x8xf32, #tpu.memory_space<vmem>> -> memref<1x8xf32, #tpu.memory_space<vmem>>
    tpu.enqueue_dma source(%70 : memref<1x8xf32, #tpu.memory_space<any>>) target(%71 : memref<1x8xf32, #tpu.memory_space<vmem>>) target_semaphore(%arg10 : memref<!tpu.dma_semaphore, #tpu.memory_space<semaphore_mem>>)
    %c24_i32_47 = arith.constant 24 : i32
    %72 = arith.muli %arg0, %c24_i32_47 : i32
    %c12_i32 = arith.constant 12 : i32
    %73 = arith.addi %72, %c12_i32 : i32
    %74 = arith.index_cast %73 : i32 to index
    %75 = memref.load %arg1[%74] : memref<48xi32, #tpu.memory_space<smem>>
    %c0_i32_48 = arith.constant 0 : i32
    %76 = tpu.memref_slice %arg2[%75, %c0_i32_48] : memref<32x8xf32, #tpu.memory_space<any>> -> memref<1x8xf32, #tpu.memory_space<any>>
    %c12_i32_49 = arith.constant 12 : i32
    %c0_i32_50 = arith.constant 0 : i32
    %77 = tpu.memref_slice %arg8[%c12_i32_49, %c0_i32_50] : memref<24x8xf32, #tpu.memory_space<vmem>> -> memref<1x8xf32, #tpu.memory_space<vmem>>
    tpu.enqueue_dma source(%76 : memref<1x8xf32, #tpu.memory_space<any>>) target(%77 : memref<1x8xf32, #tpu.memory_space<vmem>>) target_semaphore(%arg10 : memref<!tpu.dma_semaphore, #tpu.memory_space<semaphore_mem>>)
    %c24_i32_51 = arith.constant 24 : i32
    %78 = arith.muli %arg0, %c24_i32_51 : i32
    %c13_i32 = arith.constant 13 : i32
    %79 = arith.addi %78, %c13_i32 : i32
    %80 = arith.index_cast %79 : i32 to index
    %81 = memref.load %arg1[%80] : memref<48xi32, #tpu.memory_space<smem>>
    %c0_i32_52 = arith.constant 0 : i32
    %82 = tpu.memref_slice %arg2[%81, %c0_i32_52] : memref<32x8xf32, #tpu.memory_space<any>> -> memref<1x8xf32, #tpu.memory_space<any>>
    %c13_i32_53 = arith.constant 13 : i32
    %c0_i32_54 = arith.constant 0 : i32
    %83 = tpu.memref_slice %arg8[%c13_i32_53, %c0_i32_54] : memref<24x8xf32, #tpu.memory_space<vmem>> -> memref<1x8xf32, #tpu.memory_space<vmem>>
    tpu.enqueue_dma source(%82 : memref<1x8xf32, #tpu.memory_space<any>>) target(%83 : memref<1x8xf32, #tpu.memory_space<vmem>>) target_semaphore(%arg10 : memref<!tpu.dma_semaphore, #tpu.memory_space<semaphore_mem>>)
    %c24_i32_55 = arith.constant 24 : i32
    %84 = arith.muli %arg0, %c24_i32_55 : i32
    %c14_i32 = arith.constant 14 : i32
    %85 = arith.addi %84, %c14_i32 : i32
    %86 = arith.index_cast %85 : i32 to index
    %87 = memref.load %arg1[%86] : memref<48xi32, #tpu.memory_space<smem>>
    %c0_i32_56 = arith.constant 0 : i32
    %88 = tpu.memref_slice %arg2[%87, %c0_i32_56] : memref<32x8xf32, #tpu.memory_space<any>> -> memref<1x8xf32, #tpu.memory_space<any>>
    %c14_i32_57 = arith.constant 14 : i32
    %c0_i32_58 = arith.constant 0 : i32
    %89 = tpu.memref_slice %arg8[%c14_i32_57, %c0_i32_58] : memref<24x8xf32, #tpu.memory_space<vmem>> -> memref<1x8xf32, #tpu.memory_space<vmem>>
    tpu.enqueue_dma source(%88 : memref<1x8xf32, #tpu.memory_space<any>>) target(%89 : memref<1x8xf32, #tpu.memory_space<vmem>>) target_semaphore(%arg10 : memref<!tpu.dma_semaphore, #tpu.memory_space<semaphore_mem>>)
    %c24_i32_59 = arith.constant 24 : i32
    %90 = arith.muli %arg0, %c24_i32_59 : i32
    %c15_i32 = arith.constant 15 : i32
    %91 = arith.addi %90, %c15_i32 : i32
    %92 = arith.index_cast %91 : i32 to index
    %93 = memref.load %arg1[%92] : memref<48xi32, #tpu.memory_space<smem>>
    %c0_i32_60 = arith.constant 0 : i32
    %94 = tpu.memref_slice %arg2[%93, %c0_i32_60] : memref<32x8xf32, #tpu.memory_space<any>> -> memref<1x8xf32, #tpu.memory_space<any>>
    %c15_i32_61 = arith.constant 15 : i32
    %c0_i32_62 = arith.constant 0 : i32
    %95 = tpu.memref_slice %arg8[%c15_i32_61, %c0_i32_62] : memref<24x8xf32, #tpu.memory_space<vmem>> -> memref<1x8xf32, #tpu.memory_space<vmem>>
    tpu.enqueue_dma source(%94 : memref<1x8xf32, #tpu.memory_space<any>>) target(%95 : memref<1x8xf32, #tpu.memory_space<vmem>>) target_semaphore(%arg10 : memref<!tpu.dma_semaphore, #tpu.memory_space<semaphore_mem>>)
    %c24_i32_63 = arith.constant 24 : i32
    %96 = arith.muli %arg0, %c24_i32_63 : i32
    %c16_i32 = arith.constant 16 : i32
    %97 = arith.addi %96, %c16_i32 : i32
    %98 = arith.index_cast %97 : i32 to index
    %99 = memref.load %arg1[%98] : memref<48xi32, #tpu.memory_space<smem>>
    %c0_i32_64 = arith.constant 0 : i32
    %100 = tpu.memref_slice %arg2[%99, %c0_i32_64] : memref<32x8xf32, #tpu.memory_space<any>> -> memref<1x8xf32, #tpu.memory_space<any>>
    %c16_i32_65 = arith.constant 16 : i32
    %c0_i32_66 = arith.constant 0 : i32
    %101 = tpu.memref_slice %arg8[%c16_i32_65, %c0_i32_66] : memref<24x8xf32, #tpu.memory_space<vmem>> -> memref<1x8xf32, #tpu.memory_space<vmem>>
    tpu.enqueue_dma source(%100 : memref<1x8xf32, #tpu.memory_space<any>>) target(%101 : memref<1x8xf32, #tpu.memory_space<vmem>>) target_semaphore(%arg10 : memref<!tpu.dma_semaphore, #tpu.memory_space<semaphore_mem>>)
    %c24_i32_67 = arith.constant 24 : i32
    %102 = arith.muli %arg0, %c24_i32_67 : i32
    %c17_i32 = arith.constant 17 : i32
    %103 = arith.addi %102, %c17_i32 : i32
    %104 = arith.index_cast %103 : i32 to index
    %105 = memref.load %arg1[%104] : memref<48xi32, #tpu.memory_space<smem>>
    %c0_i32_68 = arith.constant 0 : i32
    %106 = tpu.memref_slice %arg2[%105, %c0_i32_68] : memref<32x8xf32, #tpu.memory_space<any>> -> memref<1x8xf32, #tpu.memory_space<any>>
    %c17_i32_69 = arith.constant 17 : i32
    %c0_i32_70 = arith.constant 0 : i32
    %107 = tpu.memref_slice %arg8[%c17_i32_69, %c0_i32_70] : memref<24x8xf32, #tpu.memory_space<vmem>> -> memref<1x8xf32, #tpu.memory_space<vmem>>
    tpu.enqueue_dma source(%106 : memref<1x8xf32, #tpu.memory_space<any>>) target(%107 : memref<1x8xf32, #tpu.memory_space<vmem>>) target_semaphore(%arg10 : memref<!tpu.dma_semaphore, #tpu.memory_space<semaphore_mem>>)
    %c24_i32_71 = arith.constant 24 : i32
    %108 = arith.muli %arg0, %c24_i32_71 : i32
    %c18_i32 = arith.constant 18 : i32
    %109 = arith.addi %108, %c18_i32 : i32
    %110 = arith.index_cast %109 : i32 to index
    %111 = memref.load %arg1[%110] : memref<48xi32, #tpu.memory_space<smem>>
    %c0_i32_72 = arith.constant 0 : i32
    %112 = tpu.memref_slice %arg2[%111, %c0_i32_72] : memref<32x8xf32, #tpu.memory_space<any>> -> memref<1x8xf32, #tpu.memory_space<any>>
    %c18_i32_73 = arith.constant 18 : i32
    %c0_i32_74 = arith.constant 0 : i32
    %113 = tpu.memref_slice %arg8[%c18_i32_73, %c0_i32_74] : memref<24x8xf32, #tpu.memory_space<vmem>> -> memref<1x8xf32, #tpu.memory_space<vmem>>
    tpu.enqueue_dma source(%112 : memref<1x8xf32, #tpu.memory_space<any>>) target(%113 : memref<1x8xf32, #tpu.memory_space<vmem>>) target_semaphore(%arg10 : memref<!tpu.dma_semaphore, #tpu.memory_space<semaphore_mem>>)
    %c24_i32_75 = arith.constant 24 : i32
    %114 = arith.muli %arg0, %c24_i32_75 : i32
    %c19_i32 = arith.constant 19 : i32
    %115 = arith.addi %114, %c19_i32 : i32
    %116 = arith.index_cast %115 : i32 to index
    %117 = memref.load %arg1[%116] : memref<48xi32, #tpu.memory_space<smem>>
    %c0_i32_76 = arith.constant 0 : i32
    %118 = tpu.memref_slice %arg2[%117, %c0_i32_76] : memref<32x8xf32, #tpu.memory_space<any>> -> memref<1x8xf32, #tpu.memory_space<any>>
    %c19_i32_77 = arith.constant 19 : i32
    %c0_i32_78 = arith.constant 0 : i32
    %119 = tpu.memref_slice %arg8[%c19_i32_77, %c0_i32_78] : memref<24x8xf32, #tpu.memory_space<vmem>> -> memref<1x8xf32, #tpu.memory_space<vmem>>
    tpu.enqueue_dma source(%118 : memref<1x8xf32, #tpu.memory_space<any>>) target(%119 : memref<1x8xf32, #tpu.memory_space<vmem>>) target_semaphore(%arg10 : memref<!tpu.dma_semaphore, #tpu.memory_space<semaphore_mem>>)
    %c24_i32_79 = arith.constant 24 : i32
    %120 = arith.muli %arg0, %c24_i32_79 : i32
    %c20_i32 = arith.constant 20 : i32
    %121 = arith.addi %120, %c20_i32 : i32
    %122 = arith.index_cast %121 : i32 to index
    %123 = memref.load %arg1[%122] : memref<48xi32, #tpu.memory_space<smem>>
    %c0_i32_80 = arith.constant 0 : i32
    %124 = tpu.memref_slice %arg2[%123, %c0_i32_80] : memref<32x8xf32, #tpu.memory_space<any>> -> memref<1x8xf32, #tpu.memory_space<any>>
    %c20_i32_81 = arith.constant 20 : i32
    %c0_i32_82 = arith.constant 0 : i32
    %125 = tpu.memref_slice %arg8[%c20_i32_81, %c0_i32_82] : memref<24x8xf32, #tpu.memory_space<vmem>> -> memref<1x8xf32, #tpu.memory_space<vmem>>
    tpu.enqueue_dma source(%124 : memref<1x8xf32, #tpu.memory_space<any>>) target(%125 : memref<1x8xf32, #tpu.memory_space<vmem>>) target_semaphore(%arg10 : memref<!tpu.dma_semaphore, #tpu.memory_space<semaphore_mem>>)
    %c24_i32_83 = arith.constant 24 : i32
    %126 = arith.muli %arg0, %c24_i32_83 : i32
    %c21_i32 = arith.constant 21 : i32
    %127 = arith.addi %126, %c21_i32 : i32
    %128 = arith.index_cast %127 : i32 to index
    %129 = memref.load %arg1[%128] : memref<48xi32, #tpu.memory_space<smem>>
    %c0_i32_84 = arith.constant 0 : i32
    %130 = tpu.memref_slice %arg2[%129, %c0_i32_84] : memref<32x8xf32, #tpu.memory_space<any>> -> memref<1x8xf32, #tpu.memory_space<any>>
    %c21_i32_85 = arith.constant 21 : i32
    %c0_i32_86 = arith.constant 0 : i32
    %131 = tpu.memref_slice %arg8[%c21_i32_85, %c0_i32_86] : memref<24x8xf32, #tpu.memory_space<vmem>> -> memref<1x8xf32, #tpu.memory_space<vmem>>
    tpu.enqueue_dma source(%130 : memref<1x8xf32, #tpu.memory_space<any>>) target(%131 : memref<1x8xf32, #tpu.memory_space<vmem>>) target_semaphore(%arg10 : memref<!tpu.dma_semaphore, #tpu.memory_space<semaphore_mem>>)
    %c24_i32_87 = arith.constant 24 : i32
    %132 = arith.muli %arg0, %c24_i32_87 : i32
    %c22_i32 = arith.constant 22 : i32
    %133 = arith.addi %132, %c22_i32 : i32
    %134 = arith.index_cast %133 : i32 to index
    %135 = memref.load %arg1[%134] : memref<48xi32, #tpu.memory_space<smem>>
    %c0_i32_88 = arith.constant 0 : i32
    %136 = tpu.memref_slice %arg2[%135, %c0_i32_88] : memref<32x8xf32, #tpu.memory_space<any>> -> memref<1x8xf32, #tpu.memory_space<any>>
    %c22_i32_89 = arith.constant 22 : i32
    %c0_i32_90 = arith.constant 0 : i32
    %137 = tpu.memref_slice %arg8[%c22_i32_89, %c0_i32_90] : memref<24x8xf32, #tpu.memory_space<vmem>> -> memref<1x8xf32, #tpu.memory_space<vmem>>
    tpu.enqueue_dma source(%136 : memref<1x8xf32, #tpu.memory_space<any>>) target(%137 : memref<1x8xf32, #tpu.memory_space<vmem>>) target_semaphore(%arg10 : memref<!tpu.dma_semaphore, #tpu.memory_space<semaphore_mem>>)
    %c24_i32_91 = arith.constant 24 : i32
    %138 = arith.muli %arg0, %c24_i32_91 : i32
    %c23_i32 = arith.constant 23 : i32
    %139 = arith.addi %138, %c23_i32 : i32
    %140 = arith.index_cast %139 : i32 to index
    %141 = memref.load %arg1[%140] : memref<48xi32, #tpu.memory_space<smem>>
    %c0_i32_92 = arith.constant 0 : i32
    %142 = tpu.memref_slice %arg2[%141, %c0_i32_92] : memref<32x8xf32, #tpu.memory_space<any>> -> memref<1x8xf32, #tpu.memory_space<any>>
    %c23_i32_93 = arith.constant 23 : i32
    %c0_i32_94 = arith.constant 0 : i32
    %143 = tpu.memref_slice %arg8[%c23_i32_93, %c0_i32_94] : memref<24x8xf32, #tpu.memory_space<vmem>> -> memref<1x8xf32, #tpu.memory_space<vmem>>
    tpu.enqueue_dma source(%142 : memref<1x8xf32, #tpu.memory_space<any>>) target(%143 : memref<1x8xf32, #tpu.memory_space<vmem>>) target_semaphore(%arg10 : memref<!tpu.dma_semaphore, #tpu.memory_space<semaphore_mem>>)
    %c0_i32_95 = arith.constant 0 : i32
    %144 = tpu.memref_slice %arg2[%3, %c0_i32_95] : memref<32x8xf32, #tpu.memory_space<any>> -> memref<1x8xf32, #tpu.memory_space<any>>
    %c0_i32_96 = arith.constant 0 : i32
    %c0_i32_97 = arith.constant 0 : i32
    %145 = tpu.memref_slice %arg8[%c0_i32_96, %c0_i32_97] : memref<24x8xf32, #tpu.memory_space<vmem>> -> memref<1x8xf32, #tpu.memory_space<vmem>>
    tpu.wait_dma2 semaphore(%arg10 : memref<!tpu.dma_semaphore, #tpu.memory_space<semaphore_mem>>) src(%144 : memref<1x8xf32, #tpu.memory_space<any>>) dst(%145 : memref<1x8xf32, #tpu.memory_space<vmem>>)
    %c0_i32_98 = arith.constant 0 : i32
    %146 = tpu.memref_slice %arg2[%9, %c0_i32_98] : memref<32x8xf32, #tpu.memory_space<any>> -> memref<1x8xf32, #tpu.memory_space<any>>
    %c1_i32_99 = arith.constant 1 : i32
    %c0_i32_100 = arith.constant 0 : i32
    %147 = tpu.memref_slice %arg8[%c1_i32_99, %c0_i32_100] : memref<24x8xf32, #tpu.memory_space<vmem>> -> memref<1x8xf32, #tpu.memory_space<vmem>>
    tpu.wait_dma2 semaphore(%arg10 : memref<!tpu.dma_semaphore, #tpu.memory_space<semaphore_mem>>) src(%146 : memref<1x8xf32, #tpu.memory_space<any>>) dst(%147 : memref<1x8xf32, #tpu.memory_space<vmem>>)
    %c0_i32_101 = arith.constant 0 : i32
    %148 = tpu.memref_slice %arg2[%15, %c0_i32_101] : memref<32x8xf32, #tpu.memory_space<any>> -> memref<1x8xf32, #tpu.memory_space<any>>
    %c2_i32_102 = arith.constant 2 : i32
    %c0_i32_103 = arith.constant 0 : i32
    %149 = tpu.memref_slice %arg8[%c2_i32_102, %c0_i32_103] : memref<24x8xf32, #tpu.memory_space<vmem>> -> memref<1x8xf32, #tpu.memory_space<vmem>>
    tpu.wait_dma2 semaphore(%arg10 : memref<!tpu.dma_semaphore, #tpu.memory_space<semaphore_mem>>) src(%148 : memref<1x8xf32, #tpu.memory_space<any>>) dst(%149 : memref<1x8xf32, #tpu.memory_space<vmem>>)
    %c0_i32_104 = arith.constant 0 : i32
    %150 = tpu.memref_slice %arg2[%21, %c0_i32_104] : memref<32x8xf32, #tpu.memory_space<any>> -> memref<1x8xf32, #tpu.memory_space<any>>
    %c3_i32_105 = arith.constant 3 : i32
    %c0_i32_106 = arith.constant 0 : i32
    %151 = tpu.memref_slice %arg8[%c3_i32_105, %c0_i32_106] : memref<24x8xf32, #tpu.memory_space<vmem>> -> memref<1x8xf32, #tpu.memory_space<vmem>>
    tpu.wait_dma2 semaphore(%arg10 : memref<!tpu.dma_semaphore, #tpu.memory_space<semaphore_mem>>) src(%150 : memref<1x8xf32, #tpu.memory_space<any>>) dst(%151 : memref<1x8xf32, #tpu.memory_space<vmem>>)
    %c0_i32_107 = arith.constant 0 : i32
    %152 = tpu.memref_slice %arg2[%27, %c0_i32_107] : memref<32x8xf32, #tpu.memory_space<any>> -> memref<1x8xf32, #tpu.memory_space<any>>
    %c4_i32_108 = arith.constant 4 : i32
    %c0_i32_109 = arith.constant 0 : i32
    %153 = tpu.memref_slice %arg8[%c4_i32_108, %c0_i32_109] : memref<24x8xf32, #tpu.memory_space<vmem>> -> memref<1x8xf32, #tpu.memory_space<vmem>>
    tpu.wait_dma2 semaphore(%arg10 : memref<!tpu.dma_semaphore, #tpu.memory_space<semaphore_mem>>) src(%152 : memref<1x8xf32, #tpu.memory_space<any>>) dst(%153 : memref<1x8xf32, #tpu.memory_space<vmem>>)
    %c0_i32_110 = arith.constant 0 : i32
    %154 = tpu.memref_slice %arg2[%33, %c0_i32_110] : memref<32x8xf32, #tpu.memory_space<any>> -> memref<1x8xf32, #tpu.memory_space<any>>
    %c5_i32_111 = arith.constant 5 : i32
    %c0_i32_112 = arith.constant 0 : i32
    %155 = tpu.memref_slice %arg8[%c5_i32_111, %c0_i32_112] : memref<24x8xf32, #tpu.memory_space<vmem>> -> memref<1x8xf32, #tpu.memory_space<vmem>>
    tpu.wait_dma2 semaphore(%arg10 : memref<!tpu.dma_semaphore, #tpu.memory_space<semaphore_mem>>) src(%154 : memref<1x8xf32, #tpu.memory_space<any>>) dst(%155 : memref<1x8xf32, #tpu.memory_space<vmem>>)
    %c0_i32_113 = arith.constant 0 : i32
    %156 = tpu.memref_slice %arg2[%39, %c0_i32_113] : memref<32x8xf32, #tpu.memory_space<any>> -> memref<1x8xf32, #tpu.memory_space<any>>
    %c6_i32_114 = arith.constant 6 : i32
    %c0_i32_115 = arith.constant 0 : i32
    %157 = tpu.memref_slice %arg8[%c6_i32_114, %c0_i32_115] : memref<24x8xf32, #tpu.memory_space<vmem>> -> memref<1x8xf32, #tpu.memory_space<vmem>>
    tpu.wait_dma2 semaphore(%arg10 : memref<!tpu.dma_semaphore, #tpu.memory_space<semaphore_mem>>) src(%156 : memref<1x8xf32, #tpu.memory_space<any>>) dst(%157 : memref<1x8xf32, #tpu.memory_space<vmem>>)
    %c0_i32_116 = arith.constant 0 : i32
    %158 = tpu.memref_slice %arg2[%45, %c0_i32_116] : memref<32x8xf32, #tpu.memory_space<any>> -> memref<1x8xf32, #tpu.memory_space<any>>
    %c7_i32_117 = arith.constant 7 : i32
    %c0_i32_118 = arith.constant 0 : i32
    %159 = tpu.memref_slice %arg8[%c7_i32_117, %c0_i32_118] : memref<24x8xf32, #tpu.memory_space<vmem>> -> memref<1x8xf32, #tpu.memory_space<vmem>>
    tpu.wait_dma2 semaphore(%arg10 : memref<!tpu.dma_semaphore, #tpu.memory_space<semaphore_mem>>) src(%158 : memref<1x8xf32, #tpu.memory_space<any>>) dst(%159 : memref<1x8xf32, #tpu.memory_space<vmem>>)
    %c0_i32_119 = arith.constant 0 : i32
    %160 = tpu.memref_slice %arg2[%51, %c0_i32_119] : memref<32x8xf32, #tpu.memory_space<any>> -> memref<1x8xf32, #tpu.memory_space<any>>
    %c8_i32_120 = arith.constant 8 : i32
    %c0_i32_121 = arith.constant 0 : i32
    %161 = tpu.memref_slice %arg8[%c8_i32_120, %c0_i32_121] : memref<24x8xf32, #tpu.memory_space<vmem>> -> memref<1x8xf32, #tpu.memory_space<vmem>>
    tpu.wait_dma2 semaphore(%arg10 : memref<!tpu.dma_semaphore, #tpu.memory_space<semaphore_mem>>) src(%160 : memref<1x8xf32, #tpu.memory_space<any>>) dst(%161 : memref<1x8xf32, #tpu.memory_space<vmem>>)
    %c0_i32_122 = arith.constant 0 : i32
    %162 = tpu.memref_slice %arg2[%57, %c0_i32_122] : memref<32x8xf32, #tpu.memory_space<any>> -> memref<1x8xf32, #tpu.memory_space<any>>
    %c9_i32_123 = arith.constant 9 : i32
    %c0_i32_124 = arith.constant 0 : i32
    %163 = tpu.memref_slice %arg8[%c9_i32_123, %c0_i32_124] : memref<24x8xf32, #tpu.memory_space<vmem>> -> memref<1x8xf32, #tpu.memory_space<vmem>>
    tpu.wait_dma2 semaphore(%arg10 : memref<!tpu.dma_semaphore, #tpu.memory_space<semaphore_mem>>) src(%162 : memref<1x8xf32, #tpu.memory_space<any>>) dst(%163 : memref<1x8xf32, #tpu.memory_space<vmem>>)
    %c0_i32_125 = arith.constant 0 : i32
    %164 = tpu.memref_slice %arg2[%63, %c0_i32_125] : memref<32x8xf32, #tpu.memory_space<any>> -> memref<1x8xf32, #tpu.memory_space<any>>
    %c10_i32_126 = arith.constant 10 : i32
    %c0_i32_127 = arith.constant 0 : i32
    %165 = tpu.memref_slice %arg8[%c10_i32_126, %c0_i32_127] : memref<24x8xf32, #tpu.memory_space<vmem>> -> memref<1x8xf32, #tpu.memory_space<vmem>>
    tpu.wait_dma2 semaphore(%arg10 : memref<!tpu.dma_semaphore, #tpu.memory_space<semaphore_mem>>) src(%164 : memref<1x8xf32, #tpu.memory_space<any>>) dst(%165 : memref<1x8xf32, #tpu.memory_space<vmem>>)
    %c0_i32_128 = arith.constant 0 : i32
    %166 = tpu.memref_slice %arg2[%69, %c0_i32_128] : memref<32x8xf32, #tpu.memory_space<any>> -> memref<1x8xf32, #tpu.memory_space<any>>
    %c11_i32_129 = arith.constant 11 : i32
    %c0_i32_130 = arith.constant 0 : i32
    %167 = tpu.memref_slice %arg8[%c11_i32_129, %c0_i32_130] : memref<24x8xf32, #tpu.memory_space<vmem>> -> memref<1x8xf32, #tpu.memory_space<vmem>>
    tpu.wait_dma2 semaphore(%arg10 : memref<!tpu.dma_semaphore, #tpu.memory_space<semaphore_mem>>) src(%166 : memref<1x8xf32, #tpu.memory_space<any>>) dst(%167 : memref<1x8xf32, #tpu.memory_space<vmem>>)
    %c0_i32_131 = arith.constant 0 : i32
    %168 = tpu.memref_slice %arg2[%75, %c0_i32_131] : memref<32x8xf32, #tpu.memory_space<any>> -> memref<1x8xf32, #tpu.memory_space<any>>
    %c12_i32_132 = arith.constant 12 : i32
    %c0_i32_133 = arith.constant 0 : i32
    %169 = tpu.memref_slice %arg8[%c12_i32_132, %c0_i32_133] : memref<24x8xf32, #tpu.memory_space<vmem>> -> memref<1x8xf32, #tpu.memory_space<vmem>>
    tpu.wait_dma2 semaphore(%arg10 : memref<!tpu.dma_semaphore, #tpu.memory_space<semaphore_mem>>) src(%168 : memref<1x8xf32, #tpu.memory_space<any>>) dst(%169 : memref<1x8xf32, #tpu.memory_space<vmem>>)
    %c0_i32_134 = arith.constant 0 : i32
    %170 = tpu.memref_slice %arg2[%81, %c0_i32_134] : memref<32x8xf32, #tpu.memory_space<any>> -> memref<1x8xf32, #tpu.memory_space<any>>
    %c13_i32_135 = arith.constant 13 : i32
    %c0_i32_136 = arith.constant 0 : i32
    %171 = tpu.memref_slice %arg8[%c13_i32_135, %c0_i32_136] : memref<24x8xf32, #tpu.memory_space<vmem>> -> memref<1x8xf32, #tpu.memory_space<vmem>>
    tpu.wait_dma2 semaphore(%arg10 : memref<!tpu.dma_semaphore, #tpu.memory_space<semaphore_mem>>) src(%170 : memref<1x8xf32, #tpu.memory_space<any>>) dst(%171 : memref<1x8xf32, #tpu.memory_space<vmem>>)
    %c0_i32_137 = arith.constant 0 : i32
    %172 = tpu.memref_slice %arg2[%87, %c0_i32_137] : memref<32x8xf32, #tpu.memory_space<any>> -> memref<1x8xf32, #tpu.memory_space<any>>
    %c14_i32_138 = arith.constant 14 : i32
    %c0_i32_139 = arith.constant 0 : i32
    %173 = tpu.memref_slice %arg8[%c14_i32_138, %c0_i32_139] : memref<24x8xf32, #tpu.memory_space<vmem>> -> memref<1x8xf32, #tpu.memory_space<vmem>>
    tpu.wait_dma2 semaphore(%arg10 : memref<!tpu.dma_semaphore, #tpu.memory_space<semaphore_mem>>) src(%172 : memref<1x8xf32, #tpu.memory_space<any>>) dst(%173 : memref<1x8xf32, #tpu.memory_space<vmem>>)
    %c0_i32_140 = arith.constant 0 : i32
    %174 = tpu.memref_slice %arg2[%93, %c0_i32_140] : memref<32x8xf32, #tpu.memory_space<any>> -> memref<1x8xf32, #tpu.memory_space<any>>
    %c15_i32_141 = arith.constant 15 : i32
    %c0_i32_142 = arith.constant 0 : i32
    %175 = tpu.memref_slice %arg8[%c15_i32_141, %c0_i32_142] : memref<24x8xf32, #tpu.memory_space<vmem>> -> memref<1x8xf32, #tpu.memory_space<vmem>>
    tpu.wait_dma2 semaphore(%arg10 : memref<!tpu.dma_semaphore, #tpu.memory_space<semaphore_mem>>) src(%174 : memref<1x8xf32, #tpu.memory_space<any>>) dst(%175 : memref<1x8xf32, #tpu.memory_space<vmem>>)
    %c0_i32_143 = arith.constant 0 : i32
    %176 = tpu.memref_slice %arg2[%99, %c0_i32_143] : memref<32x8xf32, #tpu.memory_space<any>> -> memref<1x8xf32, #tpu.memory_space<any>>
    %c16_i32_144 = arith.constant 16 : i32
    %c0_i32_145 = arith.constant 0 : i32
    %177 = tpu.memref_slice %arg8[%c16_i32_144, %c0_i32_145] : memref<24x8xf32, #tpu.memory_space<vmem>> -> memref<1x8xf32, #tpu.memory_space<vmem>>
    tpu.wait_dma2 semaphore(%arg10 : memref<!tpu.dma_semaphore, #tpu.memory_space<semaphore_mem>>) src(%176 : memref<1x8xf32, #tpu.memory_space<any>>) dst(%177 : memref<1x8xf32, #tpu.memory_space<vmem>>)
    %c0_i32_146 = arith.constant 0 : i32
    %178 = tpu.memref_slice %arg2[%105, %c0_i32_146] : memref<32x8xf32, #tpu.memory_space<any>> -> memref<1x8xf32, #tpu.memory_space<any>>
    %c17_i32_147 = arith.constant 17 : i32
    %c0_i32_148 = arith.constant 0 : i32
    %179 = tpu.memref_slice %arg8[%c17_i32_147, %c0_i32_148] : memref<24x8xf32, #tpu.memory_space<vmem>> -> memref<1x8xf32, #tpu.memory_space<vmem>>
    tpu.wait_dma2 semaphore(%arg10 : memref<!tpu.dma_semaphore, #tpu.memory_space<semaphore_mem>>) src(%178 : memref<1x8xf32, #tpu.memory_space<any>>) dst(%179 : memref<1x8xf32, #tpu.memory_space<vmem>>)
    %c0_i32_149 = arith.constant 0 : i32
    %180 = tpu.memref_slice %arg2[%111, %c0_i32_149] : memref<32x8xf32, #tpu.memory_space<any>> -> memref<1x8xf32, #tpu.memory_space<any>>
    %c18_i32_150 = arith.constant 18 : i32
    %c0_i32_151 = arith.constant 0 : i32
    %181 = tpu.memref_slice %arg8[%c18_i32_150, %c0_i32_151] : memref<24x8xf32, #tpu.memory_space<vmem>> -> memref<1x8xf32, #tpu.memory_space<vmem>>
    tpu.wait_dma2 semaphore(%arg10 : memref<!tpu.dma_semaphore, #tpu.memory_space<semaphore_mem>>) src(%180 : memref<1x8xf32, #tpu.memory_space<any>>) dst(%181 : memref<1x8xf32, #tpu.memory_space<vmem>>)
    %c0_i32_152 = arith.constant 0 : i32
    %182 = tpu.memref_slice %arg2[%117, %c0_i32_152] : memref<32x8xf32, #tpu.memory_space<any>> -> memref<1x8xf32, #tpu.memory_space<any>>
    %c19_i32_153 = arith.constant 19 : i32
    %c0_i32_154 = arith.constant 0 : i32
    %183 = tpu.memref_slice %arg8[%c19_i32_153, %c0_i32_154] : memref<24x8xf32, #tpu.memory_space<vmem>> -> memref<1x8xf32, #tpu.memory_space<vmem>>
    tpu.wait_dma2 semaphore(%arg10 : memref<!tpu.dma_semaphore, #tpu.memory_space<semaphore_mem>>) src(%182 : memref<1x8xf32, #tpu.memory_space<any>>) dst(%183 : memref<1x8xf32, #tpu.memory_space<vmem>>)
    %c0_i32_155 = arith.constant 0 : i32
    %184 = tpu.memref_slice %arg2[%123, %c0_i32_155] : memref<32x8xf32, #tpu.memory_space<any>> -> memref<1x8xf32, #tpu.memory_space<any>>
    %c20_i32_156 = arith.constant 20 : i32
    %c0_i32_157 = arith.constant 0 : i32
    %185 = tpu.memref_slice %arg8[%c20_i32_156, %c0_i32_157] : memref<24x8xf32, #tpu.memory_space<vmem>> -> memref<1x8xf32, #tpu.memory_space<vmem>>
    tpu.wait_dma2 semaphore(%arg10 : memref<!tpu.dma_semaphore, #tpu.memory_space<semaphore_mem>>) src(%184 : memref<1x8xf32, #tpu.memory_space<any>>) dst(%185 : memref<1x8xf32, #tpu.memory_space<vmem>>)
    %c0_i32_158 = arith.constant 0 : i32
    %186 = tpu.memref_slice %arg2[%129, %c0_i32_158] : memref<32x8xf32, #tpu.memory_space<any>> -> memref<1x8xf32, #tpu.memory_space<any>>
    %c21_i32_159 = arith.constant 21 : i32
    %c0_i32_160 = arith.constant 0 : i32
    %187 = tpu.memref_slice %arg8[%c21_i32_159, %c0_i32_160] : memref<24x8xf32, #tpu.memory_space<vmem>> -> memref<1x8xf32, #tpu.memory_space<vmem>>
    tpu.wait_dma2 semaphore(%arg10 : memref<!tpu.dma_semaphore, #tpu.memory_space<semaphore_mem>>) src(%186 : memref<1x8xf32, #tpu.memory_space<any>>) dst(%187 : memref<1x8xf32, #tpu.memory_space<vmem>>)
    %c0_i32_161 = arith.constant 0 : i32
    %188 = tpu.memref_slice %arg2[%135, %c0_i32_161] : memref<32x8xf32, #tpu.memory_space<any>> -> memref<1x8xf32, #tpu.memory_space<any>>
    %c22_i32_162 = arith.constant 22 : i32
    %c0_i32_163 = arith.constant 0 : i32
    %189 = tpu.memref_slice %arg8[%c22_i32_162, %c0_i32_163] : memref<24x8xf32, #tpu.memory_space<vmem>> -> memref<1x8xf32, #tpu.memory_space<vmem>>
    tpu.wait_dma2 semaphore(%arg10 : memref<!tpu.dma_semaphore, #tpu.memory_space<semaphore_mem>>) src(%188 : memref<1x8xf32, #tpu.memory_space<any>>) dst(%189 : memref<1x8xf32, #tpu.memory_space<vmem>>)
    %c0_i32_164 = arith.constant 0 : i32
    %190 = tpu.memref_slice %arg2[%141, %c0_i32_164] : memref<32x8xf32, #tpu.memory_space<any>> -> memref<1x8xf32, #tpu.memory_space<any>>
    %c23_i32_165 = arith.constant 23 : i32
    %c0_i32_166 = arith.constant 0 : i32
    %191 = tpu.memref_slice %arg8[%c23_i32_165, %c0_i32_166] : memref<24x8xf32, #tpu.memory_space<vmem>> -> memref<1x8xf32, #tpu.memory_space<vmem>>
    tpu.wait_dma2 semaphore(%arg10 : memref<!tpu.dma_semaphore, #tpu.memory_space<semaphore_mem>>) src(%190 : memref<1x8xf32, #tpu.memory_space<any>>) dst(%191 : memref<1x8xf32, #tpu.memory_space<vmem>>)
    %c0 = arith.constant 0 : index
    %c0_167 = arith.constant 0 : index
    %192 = vector.load %arg8[%c0, %c0_167] : memref<24x8xf32, #tpu.memory_space<vmem>>, vector<22x8xf32>
    %193 = arith.truncf %192 : vector<22x8xf32> to vector<22x8xbf16>
    %c0_168 = arith.constant 0 : index
    %c0_169 = arith.constant 0 : index
    %c0_170 = arith.constant 0 : index
    %194 = vector.load %arg3[%c0_168, %c0_169, %c0_170] : memref<3x8x8xbf16, #tpu.memory_space<vmem>>, vector<1x8x8xbf16>
    %195 = vector.shape_cast %194 : vector<1x8x8xbf16> to vector<8x8xbf16>
    %cst = arith.constant dense<0.000000e+00> : vector<22x8xf32>
    %196 = tpu.matmul %193, %195, %cst {dimension_numbers = #tpu.dot_dimension_numbers<[1], [0], [0], [1], [0, 0, 1, 1], [], []>} : vector<22x8xbf16>, vector<8x8xbf16>, vector<22x8xf32> -> vector<22x8xf32>
    %c1 = arith.constant 1 : index
    %c0_171 = arith.constant 0 : index
    %197 = vector.load %arg8[%c1, %c0_171] : memref<24x8xf32, #tpu.memory_space<vmem>>, vector<22x8xf32>
    %198 = arith.truncf %197 : vector<22x8xf32> to vector<22x8xbf16>
    %c1_172 = arith.constant 1 : index
    %c0_173 = arith.constant 0 : index
    %c0_174 = arith.constant 0 : index
    %199 = vector.load %arg3[%c1_172, %c0_173, %c0_174] : memref<3x8x8xbf16, #tpu.memory_space<vmem>>, vector<1x8x8xbf16>
    %200 = vector.shape_cast %199 : vector<1x8x8xbf16> to vector<8x8xbf16>
    %cst_175 = arith.constant dense<0.000000e+00> : vector<22x8xf32>
    %201 = tpu.matmul %198, %200, %cst_175 {dimension_numbers = #tpu.dot_dimension_numbers<[1], [0], [0], [1], [0, 0, 1, 1], [], []>} : vector<22x8xbf16>, vector<8x8xbf16>, vector<22x8xf32> -> vector<22x8xf32>
    %202 = arith.addf %196, %201 : vector<22x8xf32>
    %c2 = arith.constant 2 : index
    %c0_176 = arith.constant 0 : index
    %203 = vector.load %arg8[%c2, %c0_176] : memref<24x8xf32, #tpu.memory_space<vmem>>, vector<22x8xf32>
    %204 = arith.truncf %203 : vector<22x8xf32> to vector<22x8xbf16>
    %c2_177 = arith.constant 2 : index
    %c0_178 = arith.constant 0 : index
    %c0_179 = arith.constant 0 : index
    %205 = vector.load %arg3[%c2_177, %c0_178, %c0_179] : memref<3x8x8xbf16, #tpu.memory_space<vmem>>, vector<1x8x8xbf16>
    %206 = vector.shape_cast %205 : vector<1x8x8xbf16> to vector<8x8xbf16>
    %cst_180 = arith.constant dense<0.000000e+00> : vector<22x8xf32>
    %207 = tpu.matmul %204, %206, %cst_180 {dimension_numbers = #tpu.dot_dimension_numbers<[1], [0], [0], [1], [0, 0, 1, 1], [], []>} : vector<22x8xbf16>, vector<8x8xbf16>, vector<22x8xf32> -> vector<22x8xf32>
    %208 = arith.addf %202, %207 : vector<22x8xf32>
    %cst_181 = arith.constant 0.000000e+00 : f32
    %209 = vector.broadcast %cst_181 : f32 to vector<22x8xf32>
    %210 = arith.maximumf %208, %209 : vector<22x8xf32>
    %211 = vector.extract_strided_slice %210 {offsets = [0, 0], sizes = [20, 8], strides = [1, 1]} : vector<22x8xf32> to vector<20x8xf32>
    %212 = vector.extract_strided_slice %210 {offsets = [1, 0], sizes = [20, 8], strides = [1, 1]} : vector<22x8xf32> to vector<20x8xf32>
    %213 = arith.maximumf %211, %212 : vector<20x8xf32>
    %214 = vector.extract_strided_slice %210 {offsets = [2, 0], sizes = [20, 8], strides = [1, 1]} : vector<22x8xf32> to vector<20x8xf32>
    %215 = arith.maximumf %213, %214 : vector<20x8xf32>
    %c0_182 = arith.constant 0 : index
    %c0_183 = arith.constant 0 : index
    %216 = vector.load %arg9[%c0_182, %c0_183] : memref<24x16xf32, #tpu.memory_space<vmem>>, vector<20x8xf32>
    tpu.vector_store %arg9[%c0_182, %c0_183], %215 {strides = array<i32>} : memref<24x16xf32, #tpu.memory_space<vmem>>, vector<20x8xf32>,
    %c0_184 = arith.constant 0 : index
    %c0_185 = arith.constant 0 : index
    %217 = tpu.strided_load %arg9[%c0_184, %c0_185] {strides = array<i32: 2, 1>} : memref<24x16xf32, #tpu.memory_space<vmem>>, vector<9x8xf32>
    %218 = arith.truncf %217 : vector<9x8xf32> to vector<9x8xbf16>
    %c0_186 = arith.constant 0 : index
    %c0_187 = arith.constant 0 : index
    %c0_188 = arith.constant 0 : index
    %219 = vector.load %arg4[%c0_186, %c0_187, %c0_188] : memref<3x8x16xbf16, #tpu.memory_space<vmem>>, vector<1x8x16xbf16>
    %220 = vector.shape_cast %219 : vector<1x8x16xbf16> to vector<8x16xbf16>
    %cst_189 = arith.constant dense<0.000000e+00> : vector<9x16xf32>
    %221 = tpu.matmul %218, %220, %cst_189 {dimension_numbers = #tpu.dot_dimension_numbers<[1], [0], [0], [1], [0, 0, 1, 1], [], []>} : vector<9x8xbf16>, vector<8x16xbf16>, vector<9x16xf32> -> vector<9x16xf32>
    %c1_190 = arith.constant 1 : index
    %c0_191 = arith.constant 0 : index
    %222 = tpu.strided_load %arg9[%c1_190, %c0_191] {strides = array<i32: 2, 1>} : memref<24x16xf32, #tpu.memory_space<vmem>>, vector<9x8xf32>
    %223 = arith.truncf %222 : vector<9x8xf32> to vector<9x8xbf16>
    %c1_192 = arith.constant 1 : index
    %c0_193 = arith.constant 0 : index
    %c0_194 = arith.constant 0 : index
    %224 = vector.load %arg4[%c1_192, %c0_193, %c0_194] : memref<3x8x16xbf16, #tpu.memory_space<vmem>>, vector<1x8x16xbf16>
    %225 = vector.shape_cast %224 : vector<1x8x16xbf16> to vector<8x16xbf16>
    %cst_195 = arith.constant dense<0.000000e+00> : vector<9x16xf32>
    %226 = tpu.matmul %223, %225, %cst_195 {dimension_numbers = #tpu.dot_dimension_numbers<[1], [0], [0], [1], [0, 0, 1, 1], [], []>} : vector<9x8xbf16>, vector<8x16xbf16>, vector<9x16xf32> -> vector<9x16xf32>
    %227 = arith.addf %221, %226 : vector<9x16xf32>
    %c2_196 = arith.constant 2 : index
    %c0_197 = arith.constant 0 : index
    %228 = tpu.strided_load %arg9[%c2_196, %c0_197] {strides = array<i32: 2, 1>} : memref<24x16xf32, #tpu.memory_space<vmem>>, vector<9x8xf32>
    %229 = arith.truncf %228 : vector<9x8xf32> to vector<9x8xbf16>
    %c2_198 = arith.constant 2 : index
    %c0_199 = arith.constant 0 : index
    %c0_200 = arith.constant 0 : index
    %230 = vector.load %arg4[%c2_198, %c0_199, %c0_200] : memref<3x8x16xbf16, #tpu.memory_space<vmem>>, vector<1x8x16xbf16>
    %231 = vector.shape_cast %230 : vector<1x8x16xbf16> to vector<8x16xbf16>
    %cst_201 = arith.constant dense<0.000000e+00> : vector<9x16xf32>
    %232 = tpu.matmul %229, %231, %cst_201 {dimension_numbers = #tpu.dot_dimension_numbers<[1], [0], [0], [1], [0, 0, 1, 1], [], []>} : vector<9x8xbf16>, vector<8x16xbf16>, vector<9x16xf32> -> vector<9x16xf32>
    %233 = arith.addf %227, %232 : vector<9x16xf32>
    %cst_202 = arith.constant 0.000000e+00 : f32
    %234 = vector.broadcast %cst_202 : f32 to vector<9x16xf32>
    %235 = arith.maximumf %233, %234 : vector<9x16xf32>
    %c0_203 = arith.constant 0 : index
    %c0_204 = arith.constant 0 : index
    %236 = vector.load %arg9[%c0_203, %c0_204] : memref<24x16xf32, #tpu.memory_space<vmem>>, vector<9x16xf32>
    tpu.vector_store %arg9[%c0_203, %c0_204], %235 {strides = array<i32>} : memref<24x16xf32, #tpu.memory_space<vmem>>, vector<9x16xf32>,
    %c0_205 = arith.constant 0 : index
    %c0_206 = arith.constant 0 : index
    %237 = tpu.strided_load %arg9[%c0_205, %c0_206] {strides = array<i32: 2, 1>} : memref<24x16xf32, #tpu.memory_space<vmem>>, vector<4x16xf32>
    %c1_207 = arith.constant 1 : index
    %c0_208 = arith.constant 0 : index
    %238 = tpu.strided_load %arg9[%c1_207, %c0_208] {strides = array<i32: 2, 1>} : memref<24x16xf32, #tpu.memory_space<vmem>>, vector<4x16xf32>
    %239 = arith.maximumf %237, %238 : vector<4x16xf32>
    %c2_209 = arith.constant 2 : index
    %c0_210 = arith.constant 0 : index
    %240 = tpu.strided_load %arg9[%c2_209, %c0_210] {strides = array<i32: 2, 1>} : memref<24x16xf32, #tpu.memory_space<vmem>>, vector<4x16xf32>
    %241 = arith.maximumf %239, %240 : vector<4x16xf32>
    %cst_211 = arith.constant dense<0xFF800000> : vector<16xf32>
    %242 = vector.multi_reduction <maximumf>, %241, %cst_211 [0] : vector<4x16xf32> to vector<16xf32>
    %243 = vector.shape_cast %242 : vector<16xf32> to vector<1x16xf32>
    %244 = arith.truncf %243 : vector<1x16xf32> to vector<1x16xbf16>
    %c0_212 = arith.constant 0 : index
    %c0_213 = arith.constant 0 : index
    %245 = vector.load %arg5[%c0_212, %c0_213] : memref<16x128xbf16, #tpu.memory_space<vmem>>, vector<16x128xbf16>
    %cst_214 = arith.constant dense<0.000000e+00> : vector<1x128xf32>
    %246 = tpu.matmul %244, %245, %cst_214 {dimension_numbers = #tpu.dot_dimension_numbers<[1], [0], [0], [1], [0, 0, 1, 1], [], []>} : vector<1x16xbf16>, vector<16x128xbf16>, vector<1x128xf32> -> vector<1x128xf32>
    %c0_215 = arith.constant 0 : index
    %c0_216 = arith.constant 0 : index
    %247 = vector.load %arg6[%c0_215, %c0_216] : memref<1x128xf32, #tpu.memory_space<vmem>>, vector<1x128xf32>
    %248 = arith.addf %246, %247 : vector<1x128xf32>
    %c0_217 = arith.constant 0 : index
    %c0_218 = arith.constant 0 : index
    %c0_219 = arith.constant 0 : index
    %249 = vector.load %arg7[%c0_217, %c0_218, %c0_219] : memref<1x1x128xf32, #tpu.memory_space<vmem>>, vector<1x1x128xf32>
    %250 = vector.shape_cast %249 : vector<1x1x128xf32> to vector<1x128xf32>
    %251 = vector.shape_cast %248 : vector<1x128xf32> to vector<1x1x128xf32>
    tpu.vector_store %arg7[%c0_217, %c0_218, %c0_219], %251 {strides = array<i32>} : memref<1x1x128xf32, #tpu.memory_space<vmem>>, vector<1x1x128xf32>,
    return
  }
  func.func @transform_1(%arg0: i32, %arg1: memref<48xi32, #tpu.memory_space<smem>>) -> (i32, i32, i32) {
    %c0_i32 = arith.constant 0 : i32
    %c0_i32_0 = arith.constant 0 : i32
    %c0_i32_1 = arith.constant 0 : i32
    %c0_i32_2 = arith.constant 0 : i32
    return %c0_i32, %c0_i32_0, %c0_i32_1 : i32, i32, i32
  }
  func.func @transform_2(%arg0: i32, %arg1: memref<48xi32, #tpu.memory_space<smem>>) -> (i32, i32, i32) {
    %c0_i32 = arith.constant 0 : i32
    %c0_i32_0 = arith.constant 0 : i32
    %c0_i32_1 = arith.constant 0 : i32
    %c0_i32_2 = arith.constant 0 : i32
    return %c0_i32, %c0_i32_0, %c0_i32_1 : i32, i32, i32
  }
  func.func @transform_3(%arg0: i32, %arg1: memref<48xi32, #tpu.memory_space<smem>>) -> (i32, i32) {
    %c0_i32 = arith.constant 0 : i32
    %c0_i32_0 = arith.constant 0 : i32
    %c0_i32_1 = arith.constant 0 : i32
    return %c0_i32, %c0_i32_0 : i32, i32
  }
  func.func @transform_4(%arg0: i32, %arg1: memref<48xi32, #tpu.memory_space<smem>>) -> (i32, i32) {
    %c0_i32 = arith.constant 0 : i32
    %c0_i32_0 = arith.constant 0 : i32
    %c0_i32_1 = arith.constant 0 : i32
    return %c0_i32, %c0_i32_0 : i32, i32
  }
  func.func @transform_5(%arg0: i32, %arg1: memref<48xi32, #tpu.memory_space<smem>>) -> (i32, i32, i32) {
    %c0_i32 = arith.constant 0 : i32
    %c0_i32_0 = arith.constant 0 : i32
    %c0_i32_1 = arith.constant 0 : i32
    return %arg0, %c0_i32, %c0_i32_0 : i32, i32, i32
  }
}

</mosaic_0001>

<bundles_post_ra>
// kernel: tpu_custom_call.1
= control target key start
LH: loop header
LB: loop body
LE: loop exit
PB: predicated region body
PF: predicated region fallthrough
CT: control target
= control target key end

     0   :  { %s2752_s0 = inlined_call_operand.vmem [shape: s32[48], index: 0, kind: input, shape index: {}]   ;;  %s2753_s1 = inlined_call_operand.vmem [shape: f32[32,8], index: 1, kind: input, shape index: {}]   ;;  %s2754_s2 = inlined_call_operand.vmem [shape: bf16[3,8,8], index: 2, kind: input, shape index: {}]   ;;  %s2755_s3 = inlined_call_operand.vmem [shape: bf16[3,8,16], index: 3, kind: input, shape index: {}]   ;;  %s2756_s4 = inlined_call_operand.vmem [shape: bf16[16,128], index: 4, kind: input, shape index: {}]   ;;  %s2757_s5 = inlined_call_operand.vmem [shape: f32[1,128], index: 5, kind: input, shape index: {}]   ;;  %s2758_s6 = inlined_call_operand.hbm [shape: f32[2,1,128], index: 6, kind: output, shape index: {}]  }
   0x1   :  { %s11_s23 = sshll.u32 %s2752_s0, 4  ;;  %s12_s23 = int_to_ptr.vmem [resolvable:$true] %s11_s23 }
   0x2   :  { %s2373_s24 = scalar_lea.vmem %s12_s23, 16  ;;  %p2378_p1 = scmp.lt.s32.totalorder %s12_s23, %s12_s23 }
   0x3   :  { %p2374_p0 = scmp.ne.s32.totalorder %s12_s23, %s2373_s24  ;;  %p2379_p2 = scmp.lt.s32.totalorder %s2373_s24, %s2373_s24 }
   0x5   :  { %p2380_p3 = por %p2379_p2, %p2378_p1 }
   0x7   :  { %p2381_p4 = pnand %p2380_p3, %p2374_p0 }
   0x9   :  { %2384 = shalt.err (!%p2381_p4)  }
   0xa   :  { %s2451_s25 = smov [#allocation6]  }
   0xb   :  { %14 = dma.vmem_to_smem %s12_s23, 16, %s2451_s25, [#allocation5] }
   0xc   :  { %2427 = dma.done.wait [#allocation5], 16 }
   0xd   :  { %2428 = vsyncadd [#allocation5], 4294967280 }
   0xe   :  { %16 = sfence }
   0xf   :  { %17 = vsyncpa [#allocation8], 0 }
  0x10   :  { %19 = vsyncpa [#allocation8 + $0x1], 0  ;;  %s2493_s26 = smov 0   ;;  %s2495_s27 = smov 0  }
  0x11   :  { %s2497_s0 = smov 0   ;;  %s2499_s28 = smov 0  }
  0x12 LB: > { %s2514_s29 = sadd.s32 4294967295, %s2449_s28   ;;  %s2246_s30 = sadd.s32 4294967294, %s2449_s28   ;;  %s2449_s28 = sphi %s2499_s28, %s2764_s28   ;;  %s2445_s0 = sphi %s2497_s0, %s2763_s0   ;;  %s2441_s27 = sphi %s2495_s27, %s2762_s27   ;;  %s2437_s26 = sphi %s2493_s26, %s2761_s26  }
  0x13   : > { %s2518_s7 = sadd.s32 1, %s2449_s28   ;;  %s116_s8 = sadd.s32 1, %s2445_s0 }
  0x14   : > { %s113_s9 = ssub.s32 %s2449_s28, %s2518_s7  ;;  %p126_p5 = scmp.ne.s32.totalorder %s2445_s0, %s2441_s27 }
  0x15   : > { %p114_p6 = scmp.eq.s32.totalorder %s113_s9, 0  ;;  %p127_p7 = scmp.eq.s32.totalorder %s2514_s29, 1 }
  0x16   : > { %p132_p8 = scmp.ne.s32.totalorder %s2441_s27, %s2437_s26  ;;  %p133_p9 = scmp.eq.s32.totalorder %s2246_s30, 1 }
  0x17   : > { %s2529_s10 = scalar_select %p114_p6, %s2445_s0, %s116_s8  }
  0x18   : > { %p2531_p10 = por %p127_p7, %p126_p5  ;;  %p2535_p11 = por %p133_p9, %p132_p8 }
  0x19   : > { %p2248_p12 = scmp.ge.s32.totalorder %s2449_s28, 1  ;;  %p163_p13 = scmp.lt.s32.totalorder %s2449_s28, 3 }
  0x1b   : > { %p164_p0 = pnand %p2248_p12, %p163_p13 }
  0x1c   : > { %s181_s13 = sand.u32 (!%p164_p0), 1, %s2441_s27   ;;  %s2543_s14 = smul.u32 (!%p164_p0), 24, %s2514_s29 }
  0x1d   : > { %167 = sbr.rel (%p164_p0) target bundleno = 948 (0x3b4), region = 36  ;;  %s2551_s19 = scalar_lea.vmem (!%p164_p0), [#allocation7], %s181_s13 }
  0x1e   : > { %s185_s15 = sld [smem:[#allocation6 + %s2543_s14]] (!%p164_p0) }
  0x24   : > { %s186_s18 = scalar_lea.vmem %s2753_s1, %s185_s15 }
  0x25   : > { %v205_v0 = vld [vmem:[%s186_s18] sm:$0x1] }
  0x26   : > { %206 = vst [vmem:[#allocation2] sm:$0x1] %v205_v0 }
  0x27   : > { %232 = vsyncadd [#allocation4], 16  ;;  %s233_s20 = sadd.s32 1, %s2543_s14 }
  0x28   : > { %s234_s21 = sld [smem:[#allocation6 + %s233_s20]] }
  0x2e   : > { %s235_s24 = scalar_lea.vmem %s2753_s1, %s234_s21 }
  0x2f   : > { %v255_v1 = vld [vmem:[%s235_s24] sm:$0x1] }
  0x30   : > { %256 = vst [vmem:[#allocation2 + $0x1] sm:$0x1] %v255_v1 }
  0x31   : > { %282 = vsyncadd [#allocation4], 16  ;;  %s283_s25 = sadd.s32 2, %s2543_s14 }
  0x32   : > { %s284_s30 = sld [smem:[#allocation6 + %s283_s25]] }
  0x38   : > { %s285_s15 = scalar_lea.vmem %s2753_s1, %s284_s30 }
  0x39   : > { %v305_v2 = vld [vmem:[%s285_s15] sm:$0x1] }
  0x3a   : > { %306 = vst [vmem:[#allocation2 + $0x2] sm:$0x1] %v305_v2 }
  0x3b   : > { %332 = vsyncadd [#allocation4], 16  ;;  %s333_s16 = sadd.s32 3, %s2543_s14 }
  0x3c   : > { %s334_s17 = sld [smem:[#allocation6 + %s333_s16]] }
  0x42   : > { %s335_s21 = scalar_lea.vmem %s2753_s1, %s334_s17 }
  0x43   : > { %v355_v3 = vld [vmem:[%s335_s21] sm:$0x1] }
  0x44   : > { %356 = vst [vmem:[#allocation2 + $0x3] sm:$0x1] %v355_v3 }
  0x45   : > { %382 = vsyncadd [#allocation4], 16  ;;  %s383_s22 = sadd.s32 4, %s2543_s14 }
  0x46   : > { %s384_s23 = sld [smem:[#allocation6 + %s383_s22]] }
  0x4c   : > { %s385_s30 = scalar_lea.vmem %s2753_s1, %s384_s23 }
  0x4d   : > { %v405_v4 = vld [vmem:[%s385_s30] sm:$0x1] }
  0x4e   : > { %406 = vst [vmem:[#allocation2 + $0x4] sm:$0x1] %v405_v4 }
  0x4f   : > { %432 = vsyncadd [#allocation4], 16  ;;  %s433_s8 = sadd.s32 5, %s2543_s14 }
  0x50   : > { %s434_s9 = sld [smem:[#allocation6 + %s433_s8]] }
  0x56   : > { %s435_s17 = scalar_lea.vmem %s2753_s1, %s434_s9 }
  0x57   : > { %v455_v5 = vld [vmem:[%s435_s17] sm:$0x1] }
  0x58   : > { %456 = vst [vmem:[#allocation2 + $0x5] sm:$0x1] %v455_v5 }
  0x59   : > { %482 = vsyncadd [#allocation4], 16  ;;  %s483_s18 = sadd.s32 6, %s2543_s14 }
  0x5a   : > { %s484_s20 = sld [smem:[#allocation6 + %s483_s18]] }
  0x60   : > { %s485_s23 = scalar_lea.vmem %s2753_s1, %s484_s20 }
  0x61   : > { %v505_v6 = vld [vmem:[%s485_s23] sm:$0x1] }
  0x62   : > { %506 = vst [vmem:[#allocation2 + $0x6] sm:$0x1] %v505_v6 }
  0x63   : > { %532 = vsyncadd [#allocation4], 16  ;;  %s533_s24 = sadd.s32 7, %s2543_s14 }
  0x64   : > { %s534_s25 = sld [smem:[#allocation6 + %s533_s24]] }
  0x6a   : > { %s535_s9 = scalar_lea.vmem %s2753_s1, %s534_s25 }
  0x6b   : > { %v555_v7 = vld [vmem:[%s535_s9] sm:$0x1] }
  0x6c   : > { %556 = vst [vmem:[#allocation2 + $0x7] sm:$0x1] %v555_v7 }
  0x6d   : > { %582 = vsyncadd [#allocation4], 16  ;;  %s583_s15 = sadd.s32 8, %s2543_s14 }
  0x6e   : > { %s584_s16 = sld [smem:[#allocation6 + %s583_s15]] }
  0x74   : > { %s585_s20 = scalar_lea.vmem %s2753_s1, %s584_s16 }
  0x75   : > { %v605_v8 = vld [vmem:[%s585_s20] sm:$0x1] }
  0x76   : > { %606 = vst [vmem:[#allocation2 + $0x8] sm:$0x1] %v605_v8 }
  0x77   : > { %632 = vsyncadd [#allocation4], 16  ;;  %s633_s21 = sadd.s32 9, %s2543_s14 }
  0x78   : > { %s634_s22 = sld [smem:[#allocation6 + %s633_s21]] }
  0x7e   : > { %s635_s25 = scalar_lea.vmem %s2753_s1, %s634_s22 }
  0x7f   : > { %v655_v9 = vld [vmem:[%s635_s25] sm:$0x1] }
  0x80   : > { %656 = vst [vmem:[#allocation2 + $0x9] sm:$0x1] %v655_v9 }
  0x81   : > { %682 = vsyncadd [#allocation4], 16  ;;  %s683_s30 = sadd.s32 10, %s2543_s14 }
  0x82   : > { %s684_s8 = sld [smem:[#allocation6 + %s683_s30]] }
  0x88   : > { %s685_s16 = scalar_lea.vmem %s2753_s1, %s684_s8 }
  0x89   : > { %v705_v10 = vld [vmem:[%s685_s16] sm:$0x1] }
  0x8a   : > { %706 = vst [vmem:[#allocation2 + $0xa] sm:$0x1] %v705_v10 }
  0x8b   : > { %732 = vsyncadd [#allocation4], 16  ;;  %s733_s17 = sadd.s32 11, %s2543_s14 }
  0x8c   : > { %s734_s18 = sld [smem:[#allocation6 + %s733_s17]] }
  0x92   : > { %s735_s22 = scalar_lea.vmem %s2753_s1, %s734_s18 }
  0x93   : > { %v755_v11 = vld [vmem:[%s735_s22] sm:$0x1] }
  0x94   : > { %756 = vst [vmem:[#allocation2 + $0xb] sm:$0x1] %v755_v11 }
  0x95   : > { %782 = vsyncadd [#allocation4], 16  ;;  %s783_s23 = sadd.s32 12, %s2543_s14 }
  0x96   : > { %s784_s24 = sld [smem:[#allocation6 + %s783_s23]] }
  0x9c   : > { %s785_s8 = scalar_lea.vmem %s2753_s1, %s784_s24 }
  0x9d   : > { %v805_v12 = vld [vmem:[%s785_s8] sm:$0x1] }
  0x9e   : > { %806 = vst [vmem:[#allocation2 + $0xc] sm:$0x1] %v805_v12 }
  0x9f   : > { %832 = vsyncadd [#allocation4], 16  ;;  %s833_s9 = sadd.s32 13, %s2543_s14 }
  0xa0   : > { %s834_s15 = sld [smem:[#allocation6 + %s833_s9]] }
  0xa6   : > { %s835_s18 = scalar_lea.vmem %s2753_s1, %s834_s15 }
  0xa7   : > { %v855_v13 = vld [vmem:[%s835_s18] sm:$0x1] }
  0xa8   : > { %856 = vst [vmem:[#allocation2 + $0xd] sm:$0x1] %v855_v13 }
  0xa9   : > { %882 = vsyncadd [#allocation4], 16  ;;  %s883_s20 = sadd.s32 14, %s2543_s14 }
  0xaa   : > { %s884_s21 = sld [smem:[#allocation6 + %s883_s20]] }
  0xb0   : > { %s885_s24 = scalar_lea.vmem %s2753_s1, %s884_s21 }
  0xb1   : > { %v905_v14 = vld [vmem:[%s885_s24] sm:$0x1] }
  0xb2   : > { %906 = vst [vmem:[#allocation2 + $0xe] sm:$0x1] %v905_v14 }
  0xb3   : > { %932 = vsyncadd [#allocation4], 16  ;;  %s933_s25 = sadd.s32 15, %s2543_s14 }
  0xb4   : > { %s934_s30 = sld [smem:[#allocation6 + %s933_s25]] }
  0xba   : > { %s935_s15 = scalar_lea.vmem %s2753_s1, %s934_s30 }
  0xbb   : > { %v955_v15 = vld [vmem:[%s935_s15] sm:$0x1] }
  0xbc   : > { %956 = vst [vmem:[#allocation2 + $0xf] sm:$0x1] %v955_v15 }
  0xbd   : > { %982 = vsyncadd [#allocation4], 16  ;;  %s983_s16 = sadd.s32 16, %s2543_s14 }
  0xbe   : > { %s984_s17 = sld [smem:[#allocation6 + %s983_s16]] }
  0xc4   : > { %s985_s21 = scalar_lea.vmem %s2753_s1, %s984_s17 }
  0xc5   : > { %v1005_v16 = vld [vmem:[%s985_s21] sm:$0x1] }
  0xc6   : > { %1006 = vst [vmem:[#allocation2 + $0x10] sm:$0x1] %v1005_v16 }
  0xc7   : > { %1032 = vsyncadd [#allocation4], 16  ;;  %s1033_s22 = sadd.s32 17, %s2543_s14 }
  0xc8   : > { %s1034_s23 = sld [smem:[#allocation6 + %s1033_s22]] }
  0xce   : > { %s1035_s30 = scalar_lea.vmem %s2753_s1, %s1034_s23 }
  0xcf   : > { %v1055_v17 = vld [vmem:[%s1035_s30] sm:$0x1] }
  0xd0   : > { %1056 = vst [vmem:[#allocation2 + $0x11] sm:$0x1] %v1055_v17 }
  0xd1   : > { %1082 = vsyncadd [#allocation4], 16  ;;  %s1083_s8 = sadd.s32 18, %s2543_s14 }
  0xd2   : > { %s1084_s9 = sld [smem:[#allocation6 + %s1083_s8]] }
  0xd8   : > { %s1085_s17 = scalar_lea.vmem %s2753_s1, %s1084_s9 }
  0xd9   : > { %v1105_v18 = vld [vmem:[%s1085_s17] sm:$0x1] }
  0xda   : > { %1106 = vst [vmem:[#allocation2 + $0x12] sm:$0x1] %v1105_v18 }
  0xdb   : > { %1132 = vsyncadd [#allocation4], 16  ;;  %s1133_s18 = sadd.s32 19, %s2543_s14 }
  0xdc   : > { %s1134_s20 = sld [smem:[#allocation6 + %s1133_s18]] }
  0xe2   : > { %s1135_s23 = scalar_lea.vmem %s2753_s1, %s1134_s20 }
  0xe3   : > { %v1155_v19 = vld [vmem:[%s1135_s23] sm:$0x1] }
  0xe4   : > { %1156 = vst [vmem:[#allocation2 + $0x13] sm:$0x1] %v1155_v19 }
  0xe5   : > { %1182 = vsyncadd [#allocation4], 16  ;;  %s1183_s24 = sadd.s32 20, %s2543_s14 }
  0xe6   : > { %s1184_s25 = sld [smem:[#allocation6 + %s1183_s24]] }
  0xec   : > { %s1185_s9 = scalar_lea.vmem %s2753_s1, %s1184_s25 }
  0xed   : > { %v1205_v20 = vld [vmem:[%s1185_s9] sm:$0x1] }
  0xee   : > { %1206 = vst [vmem:[#allocation2 + $0x14] sm:$0x1] %v1205_v20 }
  0xef   : > { %1232 = vsyncadd [#allocation4], 16  ;;  %s1233_s15 = sadd.s32 21, %s2543_s14 }
  0xf0   : > { %s1234_s16 = sld [smem:[#allocation6 + %s1233_s15]] }
  0xf6   : > { %s1235_s20 = scalar_lea.vmem %s2753_s1, %s1234_s16 }
  0xf7   : > { %v1255_v21 = vld [vmem:[%s1235_s20] sm:$0x1] }
  0xf8   : > { %1256 = vst [vmem:[#allocation2 + $0x15] sm:$0x1] %v1255_v21 }
  0xf9   : > { %1282 = vsyncadd [#allocation4], 16  ;;  %s1283_s21 = sadd.s32 22, %s2543_s14 }
  0xfa   : > { %s1284_s22 = sld [smem:[#allocation6 + %s1283_s21]] }
 0x100   : > { %s1285_s25 = scalar_lea.vmem %s2753_s1, %s1284_s22 }
 0x101   : > { %v1305_v22 = vld [vmem:[%s1285_s25] sm:$0x1] }
 0x102   : > { %1306 = vst [vmem:[#allocation2 + $0x16] sm:$0x1] %v1305_v22 }
 0x103   : > { %1332 = vsyncadd [#allocation4], 16  ;;  %s1333_s30 = sadd.s32 23, %s2543_s14 }
 0x104   : > { %s1334_s8 = sld [smem:[#allocation6 + %s1333_s30]] }
 0x10a   : > { %s1335_s16 = scalar_lea.vmem %s2753_s1, %s1334_s8 }
 0x10b   : > { %v1355_v23 = vld [vmem:[%s1335_s16] sm:$0x1] }
 0x10c   : > { %1356 = vst [vmem:[#allocation2 + $0x17] sm:$0x1] %v1355_v23 }
 0x10d   : > { %1382 = vsyncadd [#allocation4], 16 }
 0x10e   : > { %2429 = dma.done.wait [#allocation4], 384 }
 0x10f   : > { %2430 = vsyncadd [#allocation4], 4294966912  ;;  %vm1452_vm0 = vcmask 1043456   ;;  %v2249_v24 = vld [vmem:[%s2754_s2 + $0x4] sm:$0xf]  ;;  %v1439_v29 = vld [vmem:[#allocation2 + $0x9] sm:$0xff] }
 0x110   : > { %v1437_v25 = vld [vmem:[%s2754_s2] sm:$0xf]  ;;  %2327 = vmatprep.subr.msk.bf16.mxu0 %vm1452_vm0, %v2249_v24  ;;  %v1454_v27 = vsel %vm1452_vm0, %v2249_v24, 0  ;;  %vm1445_vm1 = vcmask 64512   ;;  %v1433_v31 = vld [vmem:[#allocation2 + $0x8] sm:$0xff]  ;;  %v2452_v47 = vmov 0.0  }
 0x111   : > { %v1438_v26 = vld [vmem:[#allocation2 + $0x1] sm:$0xff]  ;;  %2328 = vmatprep.subr.msk.bf16.mxu1 %vm1452_vm0, %v1437_v25  ;;  %v1511_v28 = vsel %vm1452_vm0, %v1437_v25, 0  ;;  %2286 = vmatpush3.bf16.msra.mxu0 %v1454_v27  ;;  %v1440_v34 = vld [vmem:[#allocation2 + $0x11] sm:$0x3f]  ;;  %vm2453_vm2 = vmmov 0   ;;  %vm1660_vm3 = vcmask 60416  }
 0x112   : > { %v1432_v30 = vld [vmem:[#allocation2] sm:$0xff]  ;;  %2292 = vmatpush3.bf16.msra.mxu1 %v1511_v28  ;;  %v1441_v32 = vpack.c.bf16 %v1439_v29, %v1438_v26  ;;  %v1434_v35 = vld [vmem:[#allocation2 + $0x10] sm:$0x3f]  ;;  %v2254_v36 = vld [vmem:[%s2754_s2 + $0x8] sm:$0xf]  ;;  %v1442_v37 = vpack.c.bf16 %v1440_v34, %v1440_v34  ;;  %vm1634_vm4 = vcmask 1046528  }
 0x113   : > { %v1435_v33 = vpack.c.bf16 %v1433_v31, %v1432_v30  ;;  %v1436_v38 = vpack.c.bf16 %v1434_v35, %v1434_v35  ;;  %2329 = vmatprep.subr.msk.bf16.mxu0 %vm1452_vm0, %v2254_v36  ;;  %v1575_v39 = vsel %vm1452_vm0, %v2254_v36, 0  ;;  %v1561_v40 = vld [vmem:[#allocation2 + $0x2] sm:$0xff]  ;;  %v1562_v41 = vld [vmem:[#allocation2 + $0xa] sm:$0xff]  ;;  %v1563_v43 = vld [vmem:[#allocation2 + $0x12] sm:$0x3f]  ;;  %2303 = vmatprep.subr.bf16.mxu1 %v2452_v47  ;;  %vm1646_vm5 = vcmask 1045504  }
 0x114   : > { %2287 = vmatprep.mubr.msk.bf16.mxu0 %vm1445_vm1, %v1441_v32  ;;  %v1564_v42 = vpack.c.bf16 %v1562_v41, %v1561_v40  ;;  %v1565_v44 = vpack.c.bf16 %v1563_v43, %v1563_v43  ;;  %v2257_v45 = vld [vmem:[%s2755_s3 + $0x4] sm:$0xf]  ;;  %v1666_v46 = vld [vmem:[%s2755_s3] sm:$0xf]  ;;  %v2260_v23 = vld [vmem:[%s2755_s3 + $0x8] sm:$0xf] }
 0x115   : > { %2293 = vmatprep.mubr.msk.bf16.mxu1 %vm1445_vm1, %v1435_v33  ;;  %2288 = vmatmul.mubr.msk.bf16.vlgmr.msra.gmra.mxu0 %vm1445_vm1, %v1442_v37  ;;  %v1678_v48 = vsel %vm1452_vm0, %v2257_v45, 0  ;;  %v1725_v49 = vsel %vm1452_vm0, %v1666_v46, 0  ;;  %v1779_v30 = vsel %vm1452_vm0, %v2260_v23, 0  ;;  %v2372_v34 = vld [vmem:[%s2756_s4] sm:$0xff]   ;;  %vm1826_vm6 = vcmask 130048   ;;  %s2264_s20 = sshll.u32 %s2514_s29, 4 }
 0x116   : > { %2294 = vmatmul.mubr.msk.bf16.vlgmr.msra.gmra.mxu1 %vm1445_vm1, %v1436_v38  ;;  %2298 = vmatpush3.bf16.msra.mxu0 %v1575_v39  ;;  %vm1828_vm7 = vcmask 122880   ;;  %vm1835_vm8 = vcmask 125952   ;;  %s1910_s21 = sshll.u32 %s2551_s19, 4  ;;  %s2708_s23 = scalar_lea.hbm %s2758_s6, %s2264_s20  ;;  %s2710_s21 = int_to_ptr.vmem [resolvable:$true] %s1910_s21 }
 0x117   : > { %2299 = vmatprep.mubr.msk.bf16.mxu0 %vm1445_vm1, %v1564_v42  ;;  %2309 = vmatprep.subr.bf16.mxu0 %v2452_v47  ;;  %s1898_s24 = scalar_lea.sflag [#allocation8], %s181_s13  ;;  %s2385_s25 = scalar_lea.vmem %s2710_s21, 16 }
 0x118   : > { %2304 = vmatpush3.bf16.msra.mxu1 %v1678_v48  ;;  %2305 = vmatprep.mubr.msk.bf16.mxu1 %vm2453_vm2, %v2452_v47  ;;  %p2386_p1 = scmp.ne.s32.totalorder %s2710_s21, %s2385_s25  ;;  %s2454_s29 = smov [#allocation7]  }
 0x119   : > { %2315 = vmatprep.subr.bf16.mxu1 %v2452_v47  ;;  %s2389_s30 = sshll.u32 %s2454_s29, 4  ;;  %s2390_s30 = int_to_ptr.vmem [resolvable:$false] %s2389_s30 }
 0x11a   : > { %p2387_p2 = pnand %p2386_p1, %p2531_p10  ;;  %s2391_s8 = scalar_lea.vmem %s2390_s30, 32 }
 0x11b   : > { %p2392_p4 = scmp.lt.s32.totalorder %s2710_s21, %s2390_s30  ;;  %p2393_p5 = scmp.lt.s32.totalorder %s2391_s8, %s2385_s25 }
 0x11c   : > { %p2388_p3 = pneg %p2387_p2 }
 0x11d   : > { %2300 = vmatmul.mubr.msk.bf16.vlgmr.msra.gmra.mxu0 %vm1445_vm1, %v1565_v44  ;;  %p2394_p6 = por %p2393_p5, %p2392_p4 }
 0x11e   : > { %2310 = vmatpush3.bf16.msra.mxu0 %v1725_v49  ;;  %2311 = vmatprep.mubr.msk.bf16.mxu0 %vm2453_vm2, %v2452_v47 }
 0x11f   : > { %2321 = vmatprep.subr.bf16.mxu0 %v2452_v47  ;;  %p2395_p7 = pnand %p2394_p6, %p2388_p3 }
 0x1d5   : > { %v2289_v50 = vpop.f32.mrf.mxu0 }
 0x1d6   : > { %v2295_v51 = vpop.f32.mrf.mxu1 }
 0x1d7   : > { %v1490_v52 = vpop.f32.mrf.mxu0  ;;  %v1556_v57 = vadd.f32 %v2295_v51, %v2289_v50 }
 0x1d8   : > { %v1547_v53 = vpop.f32.mrf.mxu1 }
 0x1d9   : > { %v2290_v54 = vpop.f32.mrf.mxu0  ;;  %v1548_v59 = vadd.f32 %v1547_v53, %v1490_v52 }
 0x1da   : > { %v2296_v55 = vpop.f32.mrf.mxu1 }
 0x1db   : > { %v1493_v56 = vpop.f32.mrf.mxu0 }
 0x1dc   : > { %v1550_v61 = vpop.f32.mrf.mxu1 }
 0x1dd   : > { %v2301_v58 = vpop.f32.mrf.mxu0  ;;  %v1551_v2 = vadd.f32 %v1550_v61, %v1493_v56 }
 0x1de   : > { %v1627_v60 = vadd.f32 %v2301_v58, %v1556_v57 }
 0x1df   : > { %v1611_v62 = vpop.f32.mrf.mxu0 }
 0x1e0   : > { %v1630_v63 = vmax.f32 %v1627_v60, 0.0  ;;  %v1625_v0 = vadd.f32 %v1611_v62, %v1548_v59 }
 0x1e1   : > { %v2302_v1 = vpop.f32.mrf.mxu0 }
 0x1e2   : > { %v1638_v3 = vrot.slane %v1630_v63, 1  ;;  %v1650_v6 = vrot.slane %v1630_v63, 2  ;;  %v1628_v7 = vmax.f32 %v1625_v0, 0.0 }
 0x1e3   : > { %v1614_v4 = vpop.f32.mrf.mxu0 }
 0x1e4   : > { %v1645_v5 = vmax.f32 %v1630_v63, %v1638_v3  ;;  %v1626_v8 = vadd.f32 %v1614_v4, %v1551_v2  ;;  %v1635_v11 = vrot.slane %v1628_v7, 1  ;;  %v1647_v14 = vrot.slane %v1628_v7, 2  ;;  %v1846_v2 = vld [vmem:[%s2757_s5] sm:$0x1] }
 0x1e6   : > { %v1657_v9 = vmax.f32 %v1645_v5, %v1650_v6  ;;  %v1629_v10 = vmax.f32 %v1626_v8, 0.0 }
 0x1e8   : > { %1661 = vst.msk [vmem:[#allocation3 + $0x10] sm:$0xf] %vm1660_vm3, %v1657_v9  ;;  %v1636_v12 = vrot.slane %v1629_v10, 1  ;;  %v1648_v13 = vrot.slane %v1629_v10, 2 }
 0x1ea   : > { %v1637_v15 = vsel %vm1634_vm4, %v1635_v11, %v1636_v12  ;;  %v1639_v16 = vsel %vm1634_vm4, %v1636_v12, %v1638_v3  ;;  %v1649_v19 = vsel %vm1646_vm5, %v1647_v14, %v1648_v13  ;;  %v1651_v20 = vsel %vm1646_vm5, %v1648_v13, %v1650_v6 }
 0x1eb   : > { %v1643_v17 = vmax.f32 %v1628_v7, %v1637_v15  ;;  %v1644_v18 = vmax.f32 %v1629_v10, %v1639_v16 }
 0x1ed   : > { %v1655_v21 = vmax.f32 %v1643_v17, %v1649_v19  ;;  %v1656_v22 = vmax.f32 %v1644_v18, %v1651_v20 }
 0x1ef   : > { %1658 = vst.msk [vmem:[#allocation3] sm:$0xff] %vm1445_vm1, %v1655_v21  ;;  %1659 = vst.msk [vmem:[#allocation3 + $0x8] sm:$0xff] %vm1445_vm1, %v1656_v22  ;;  %v1670_v24 = vld [vmem:[#allocation3 + $0x11] ss:$2 sm:$0x1] }
 0x1f0   : > { %v1664_v25 = vld [vmem:[#allocation3 + $0x10] ss:$2 sm:$0x1]  ;;  %v1771_v32 = vld [vmem:[#allocation3 + $0x12] ss:$2 sm:$0x1] }
 0x1f6   : > { %v1668_v26 = vld [vmem:[#allocation3 + $0x1] ss:$2 sm:$0xff]  ;;  %v1662_v27 = vld [vmem:[#allocation3] ss:$2 sm:$0xff] }
 0x1f7   : > { %v1671_v28 = vpack.c.bf16 %v1670_v24, %v1668_v26  ;;  %v1665_v29 = vpack.c.bf16 %v1664_v25, %v1662_v27  ;;  %v1769_v31 = vld [vmem:[#allocation3 + $0x2] ss:$2 sm:$0xff] }
 0x1f8   : > { %v1772_v33 = vpack.c.bf16 %v1771_v32, %v1769_v31 }
 0x1f9   : > { %2306 = vmatmul.mubr.msk.bf16.vlgmr.msra.gmra.mxu1 %vm1445_vm1, %v1671_v28  ;;  %2312 = vmatmul.mubr.msk.bf16.vlgmr.msra.gmra.mxu0 %vm1445_vm1, %v1665_v29 }
 0x1fa   : > { %2316 = vmatpush3.bf16.msra.mxu1 %v1779_v30  ;;  %2317 = vmatprep.mubr.msk.bf16.mxu1 %vm2453_vm2, %v2452_v47 }
 0x1fb   : > { %2323 = vmatprep.mubr.msk.bf16.mxu0 %vm2453_vm2, %v2452_v47  ;;  %2322 = vmatpush3.bf16.msra.mxu0 %v2372_v34 }
 0x201   : > { %2318 = vmatmul.mubr.msk.bf16.vlgmr.msra.gmra.mxu1 %vm1445_vm1, %v1772_v33 }
 0x2b9   : > { %v1714_v35 = vpop.f32.mrf.mxu1  ;;  %v1761_v36 = vpop.f32.mrf.mxu0 }
 0x2ba   : > { %v1762_v43 = vadd.f32 %v1761_v36, %v1714_v35 }
 0x2bb   : > { %v2307_v37 = vpop.f32.mrf.mxu1  ;;  %v2313_v38 = vpop.f32.mrf.mxu0 }
 0x2bd   : > { %v1717_v39 = vpop.f32.mrf.mxu1  ;;  %v1764_v40 = vpop.f32.mrf.mxu0 }
 0x2be   : > { %v1765_v47 = vadd.f32 %v1764_v40, %v1717_v39 }
 0x2bf   : > { %v2308_v41 = vpop.f32.mrf.mxu1  ;;  %v2314_v42 = vpop.f32.mrf.mxu0 }
 0x2c1   : > { %v1815_v44 = vpop.f32.mrf.mxu1 }
 0x2c2   : > { %v1822_v45 = vadd.f32 %v1815_v44, %v1762_v43 }
 0x2c3   : > { %v2319_v46 = vpop.f32.mrf.mxu1 }
 0x2c4   : > { %v1824_v48 = vmax.f32 %v1822_v45, 0.0 }
 0x2c5   : > { %v1818_v49 = vpop.f32.mrf.mxu1 }
 0x2c6   : > { %v1823_v50 = vadd.f32 %v1818_v49, %v1765_v47  ;;  %1827 = vst.msk [vmem:[#allocation3] sm:$0xff] %vm1826_vm6, %v1824_v48 }
 0x2c7   : > { %v2320_v51 = vpop.f32.mrf.mxu1 }
 0x2c8   : > { %v1825_v52 = vmax.f32 %v1823_v50, 0.0 }
 0x2ca   : > { %1829 = vst.msk [vmem:[#allocation3 + $0x8] sm:$0x1] %vm1828_vm7, %v1825_v52 }
 0x2cd   : > { %v1830_v53 = vld [vmem:[#allocation3] ss:$2 sm:$0xf]  ;;  %v1831_v54 = vld [vmem:[#allocation3 + $0x1] ss:$2 sm:$0xf] }
 0x2ce   : > { %v1832_v55 = vmax.f32 %v1830_v53, %v1831_v54 }
 0x2d1   : > { %v1833_v56 = vld [vmem:[#allocation3 + $0x2] ss:$2 sm:$0xf] }
 0x2d2   : > { %v1834_v57 = vmax.f32 %v1832_v55, %v1833_v56 }
 0x2d4   : > { %v1836_v58 = vsel %vm1835_vm8, %v1834_v57, -inf }
 0x2d5   : > { %v1837_v59 = vrot.slane %v1836_v58, 4 }
 0x2d7   : > { %v1838_v60 = vmax.f32 %v1836_v58, %v1837_v59 }
 0x2d9   : > { %v1839_v61 = vrot.slane %v1838_v60, 2 }
 0x2db   : > { %v1840_v62 = vmax.f32 %v1838_v60, %v1839_v61 }
 0x2dd   : > { %v1841_v63 = vrot.slane %v1840_v62, 1 }
 0x2df   : > { %v1842_v0 = vmax.f32 %v1840_v62, %v1841_v63 }
 0x2e1   : > { %v1843_v1 = vpack.c.bf16 %v1842_v0, %v1842_v0 }
 0x2e3   : > { %2324 = vmatmul.mubr.msk.bf16.vlgmr.msra.gmra.mxu0 %vm1826_vm6, %v1843_v1 }
 0x3a3   : > { %v1890_v3 = vpop.f32.mrf.mxu0 }
 0x3a4   : > { %v1891_v4 = vadd.f32 %v1890_v3, %v1846_v2 }
 0x3a5   : > { %v2325_v5 = vpop.f32.mrf.mxu0 }
 0x3a6   : > { %1896 = vst [vmem:[%s2551_s19] sm:$0x1] %v1891_v4 }
 0x3a7   : > { %v1893_v6 = vpop.f32.mrf.mxu0 }
 0x3a8   : > { %2398 = shalt.err (!%p2395_p7)
}
 0x3a9   : > { %s2399_s19 = scalar_lea.hbm %s2708_s23, 16  ;;  %s2403_s15 = scalar_lea.hbm %s2758_s6, 32 }
 0x3aa   : > { %p2400_p8 = scmp.ne.s32.totalorder %s2708_s23, %s2399_s19  ;;  %p2404_p13 = scmp.lt.s32.totalorder %s2708_s23, %s2758_s6 }
 0x3ab   : > { %p2405_p0 = scmp.lt.s32.totalorder %s2403_s15, %s2399_s19 }
 0x3ac   : > { %p2401_p9 = pnand %p2400_p8, %p2531_p10 }
 0x3ad   : > { %p2406_p1 = por %p2405_p0, %p2404_p13 }
 0x3ae   : > { %p2402_p12 = pneg %p2401_p9 }
 0x3b0   : > { %p2407_p2 = pnand %p2406_p1, %p2402_p12 }
 0x3b2   : > { %2410 = shalt.err (!%p2407_p2)
}
 0x3b3   : > { %2330 = dma.vmem_to_hbm [thread:$0]  (%p2531_p10), %s2710_s21, 16, %s2708_s23, %s1898_s24   ;;  %v2326_v7 = vpop.f32.mrf.mxu0 }
 0x3b4 PF: > { %p2336_p3 = scmp.ge.s32.totalorder %s2449_s28, 2  ;;  %s1922_s18 = sand.u32 1, %s2437_s26  }
 0x3b5   : > { %s1923_s20 = scalar_lea.sflag [#allocation8], %s1922_s18 }
 0x3b6   : > { %p2333_p4 = pnand %p2336_p3, %p2535_p11 }
 0x3b8   : > { %p2334_p5 = pneg %p2333_p4 }
 0x3ba   : > { %2432 = dma.done.wait (%p2334_p5), %s1923_s20, 16  }
 0x3bb   : > { %2434 = vsyncadd (%p2334_p5), %s1923_s20, 4294967280  ;;  %p22_p6 = scmp.ge.s32.totalorder %s2518_s7, 4   ;;  %s2761_s26 = smov %s2441_s27 }
 0x3bc   : > { %s2762_s27 = smov %s2445_s0  ;;  %s2763_s0 = smov %s2529_s10 }
 0x3bd   : > { %s2764_s28 = smov %s2518_s7  ;;  %24 = sbr.rel (!%p22_p6) target bundleno = 18 (0x12), region = 1084 }
 0x3c2   :  { %1927 = vsyncpa [#allocation8], 1 }
 0x3c3   :  { %1929 = vsyncpa [#allocation8 + $0x1], 1 }
 0x3c4   :  { %1930 = vsyncmov [#allocation4] }
 0x3c7   :  { %s1931_s28 = vpop.sfrf %1930 }
 0x3c8   :  { %p2267_p10 = scmp.ne.s32.totalorder %s1931_s28, 0 }
 0x3ca   :  { %1935 = shalt.err (%p2267_p10)  }

</bundles_post_ra>
